<compile_context>
chip_gen: v6e
topology: v6e:2x2x1
jax: 0.10.0
libtpu: 0.0.40
codegen_flags: <defaults>
</compile_context>

<pallas_src>
import functools

import jax
import jax.numpy as jnp
from jax.experimental import pallas as pl
from jax.experimental.pallas import tpu as pltpu


def _encoder_lstm_kernel(x_ref, w_ih_ref, w_hh_ref, b_ref,
                         h_out_ref, c_out_ref,
                         xbuf_ref, xproj_ref,
                         *, seq_len, n_layers, hid_dim, unroll):
  """Fused multi-layer LSTM over the full sequence (single invocation).

  x_ref     : (S, B, E)   embedded input (layer-0 features)
  w_ih_ref  : (L, F, 4H)  fused gate input weights, F = max(E, H), zero-padded
                          rows beyond each layer's true input width;
                          gate-column order (i, f, g, o), g cols pre-scaled by 2
  w_hh_ref  : (L, H, 4H)  fused recurrent weights (same pre-scaling)
  b_ref     : (L, 1, 4H)  b_ih + b_hh (same pre-scaling), f32
  h_out_ref, c_out_ref : (L, B, H) final hidden / cell states
  xbuf_ref  : (S, B, H)   VMEM scratch: inter-layer activations (never hits HBM)
  xproj_ref : (S, B, 4H)  VMEM scratch: hoisted per-layer input projection
  """
  S = seq_len
  H = hid_dim
  B = x_ref.shape[1]
  E = x_ref.shape[2]

  for layer in range(n_layers):               # static unroll over layers
    in_feat = E if layer == 0 else H
    w_ih = w_ih_ref[layer][:in_feat, :]       # (in_feat, 4H) static slice
    w_hh = w_hh_ref[layer]                    # (H, 4H)
    b = b_ref[layer]                          # (1, 4H) f32
    write_next = layer < n_layers - 1

    # ---- Hoisted non-recurrent projection: one big MXU matmul over S*B rows.
    # (Read of xbuf_ref happens before the time-loop writes below, so in-place
    #  reuse of the buffer across layers is safe.)
    src = x_ref[...] if layer == 0 else xbuf_ref[...]       # (S, B, in_feat)
    src2d = src.reshape(S * B, in_feat)
    xproj = jnp.dot(src2d, w_ih, preferred_element_type=jnp.float32) + b
    xproj_ref[...] = xproj.reshape(S, B, 4 * H)

    # ---- Serial recurrence: only the (B, H) x (H, 4H) matmul remains inside.
    def step(t, carry, w_hh=w_hh, write_next=write_next):
      h_prev, c_prev = carry                  # (B, H) f32
      gates = (xproj_ref[t]
               + jnp.dot(h_prev.astype(w_hh.dtype), w_hh,
                         preferred_element_type=jnp.float32))   # (B, 4H) f32
      # One EUP pass over the whole lane-dense slab; g columns were pre-scaled
      # by 2 so tanh(g_raw) == 2*sigmoid(2*g_raw) - 1.
      s = jax.nn.sigmoid(gates)
      # NOTE: with H not a multiple of 128 these are sub-vreg lane slices; fine
      # at toy H, revisit (XLU roll + masks) if it shows up on the critical path.
      i_g = s[:, 0 * H:1 * H]
      f_g = s[:, 1 * H:2 * H]
      g_g = 2.0 * s[:, 2 * H:3 * H] - 1.0
      o_g = s[:, 3 * H:4 * H]
      c_new = f_g * c_prev + i_g * g_g
      h_new = o_g * jnp.tanh(c_new)
      if write_next:
        xbuf_ref[t] = h_new.astype(xbuf_ref.dtype)
      return h_new, c_new

    init = (jnp.zeros((B, H), jnp.float32), jnp.zeros((B, H), jnp.float32))
    h_T, c_T = jax.lax.fori_loop(0, S, step, init, unroll=unroll)
    h_out_ref[layer] = h_T.astype(h_out_ref.dtype)
    c_out_ref[layer] = c_T.astype(c_out_ref.dtype)


def encoder_lstm(x, w_ih, w_hh, b, *, unroll=8):
  """x: (S, B, E); w_ih: (L, F, 4H); w_hh: (L, H, 4H); b: (L, 1, 4H)."""
  S, B, E = x.shape
  n_layers = w_ih.shape[0]
  H = w_hh.shape[1]
  kernel = functools.partial(_encoder_lstm_kernel, seq_len=S,
                             n_layers=n_layers, hid_dim=H,
                             unroll=min(unroll, S))

  def nbytes(a):
    return a.size * a.dtype.itemsize

  scratch_bytes = (S * B * H * x.dtype.itemsize        # xbuf
                   + S * B * 4 * H * 4)                # xproj (f32)
  out_bytes = 2 * n_layers * B * H * 4
  total_bytes = (nbytes(x) + nbytes(w_ih) + nbytes(w_hh) + nbytes(b)
                 + scratch_bytes + out_bytes)
  # Headroom for compiler temporaries; valid on v5e/v6e/v7x (<= 64 MiB).
  vmem_limit = min(max(2 * total_bytes + (4 << 20), 32 << 20), 64 << 20)

  return pl.pallas_call(
      kernel,
      out_shape=(jax.ShapeDtypeStruct((n_layers, B, H), jnp.float32),
                 jax.ShapeDtypeStruct((n_layers, B, H), jnp.float32)),
      in_specs=[pl.BlockSpec(memory_space=pltpu.MemorySpace.VMEM)
                for _ in range(4)],
      out_specs=(pl.BlockSpec(memory_space=pltpu.MemorySpace.VMEM),
                 pl.BlockSpec(memory_space=pltpu.MemorySpace.VMEM)),
      scratch_shapes=[pltpu.VMEM((S, B, H), x.dtype),
                      pltpu.VMEM((S, B, 4 * H), jnp.float32)],
      compiler_params=pltpu.CompilerParams(vmem_limit_bytes=int(vmem_limit)),
  )(x, w_ih, w_hh, b)


def init_encoder_params(key, input_dim, emb_dim, hid_dim, n_layers):
  """PyTorch-style raw parameters (also used by the pure-JAX reference)."""
  params = {}
  key, sub = jax.random.split(key)
  params["embedding"] = jax.random.normal(sub, (input_dim, emb_dim), jnp.float32)
  bound = 1.0 / float(hid_dim) ** 0.5
  layers = []
  for layer in range(n_layers):
    in_feat = emb_dim if layer == 0 else hid_dim
    key, k1, k2, k3, k4 = jax.random.split(key, 5)
    layers.append({
        "w_ih": jax.random.uniform(k1, (4 * hid_dim, in_feat), jnp.float32,
                                   -bound, bound),
        "w_hh": jax.random.uniform(k2, (4 * hid_dim, hid_dim), jnp.float32,
                                   -bound, bound),
        "b_ih": jax.random.uniform(k3, (4 * hid_dim,), jnp.float32, -bound, bound),
        "b_hh": jax.random.uniform(k4, (4 * hid_dim,), jnp.float32, -bound, bound),
    })
  params["layers"] = layers
  return params


def pack_encoder_params(raw, compute_dtype=jnp.float32):
  """One-time conversion: PyTorch layout -> fused kernel layout.

  (4H, in) -> (F, 4H) with F = max(emb_dim, hid_dim) (zero rows pad unused inputs;
  the kernel statically slices the valid rows per layer). The g-gate columns of
  W_ih, W_hh and the bias are pre-scaled by 2 so the kernel can use a single
  sigmoid pass (tanh(x) = 2*sigmoid(2x) - 1). These packed weights are for the
  kernel only — do not feed them to code expecting raw PyTorch weights.
  `compute_dtype=jnp.bfloat16` enables bf16 MXU operands on v6e/v7x (h/c state,
  bias and all accumulation stay f32).
  """
  emb = raw["embedding"]
  emb_dim = emb.shape[1]
  H = raw["layers"][0]["w_hh"].shape[1]
  F = max(emb_dim, H)
  g_scale = jnp.concatenate([jnp.ones((2 * H,), jnp.float32),
                             2.0 * jnp.ones((H,), jnp.float32),
                             jnp.ones((H,), jnp.float32)])
  w_ih_all, w_hh_all, b_all = [], [], []
  for layer, lp in enumerate(raw["layers"]):
    in_feat = emb_dim if layer == 0 else H
    w_ih = jnp.zeros((F, 4 * H), jnp.float32).at[:in_feat, :].set(lp["w_ih"].T)
    w_hh = lp["w_hh"].T                               # (H, 4H)
    b = (lp["b_ih"] + lp["b_hh"])[None, :]            # (1, 4H)
    w_ih_all.append(w_ih * g_scale)
    w_hh_all.append(w_hh * g_scale)
    b_all.append(b * g_scale)
  return {
      "embedding": emb,
      "w_ih": jnp.stack(w_ih_all).astype(compute_dtype),   # (L, F, 4H)
      "w_hh": jnp.stack(w_hh_all).astype(compute_dtype),   # (L, H, 4H)
      "b": jnp.stack(b_all).astype(jnp.float32),           # (L, 1, 4H)
  }


@jax.jit
def encoder_forward(packed, tokens):
  """tokens: (S, B) int32 -> (hidden, cell), each (n_layers, B, H)."""
  S, B = tokens.shape
  emb = jnp.take(packed["embedding"], tokens, axis=0)   # (S, B, E)
  # Eval-mode dropout on the embedding is the identity.
  # Pad batch to a multiple of 8 (TPU sublane); padded rows are sliced off.
  B_pad = max(8, ((B + 7) // 8) * 8)
  if B_pad != B:
    emb = jnp.pad(emb, ((0, 0), (0, B_pad - B), (0, 0)))
  x = emb.astype(packed["w_ih"].dtype)
  h, c = encoder_lstm(x, packed["w_ih"], packed["w_hh"], packed["b"])
  return h[:, :B, :], c[:, :B, :]


def encoder_forward_reference(raw, tokens):
  """Pure-JAX eval-mode reference (standard LSTM equations, f32, HIGHEST precision)."""
  hp = jax.lax.Precision.HIGHEST
  x = jnp.take(raw["embedding"], tokens, axis=0)   # (S, B, E)
  hs, cs = [], []
  for lp in raw["layers"]:
    w_ih, w_hh = lp["w_ih"], lp["w_hh"]
    b = lp["b_ih"] + lp["b_hh"]
    H = w_hh.shape[1]
    B = x.shape[1]

    def step(carry, x_t, w_ih=w_ih, w_hh=w_hh, b=b):
      h, c = carry
      gates = (jnp.dot(x_t, w_ih.T, precision=hp)
               + jnp.dot(h, w_hh.T, precision=hp) + b)
      i, f, g, o = jnp.split(gates, 4, axis=-1)
      c = jax.nn.sigmoid(f) * c + jax.nn.sigmoid(i) * jnp.tanh(g)
      h = jax.nn.sigmoid(o) * jnp.tanh(c)
      return (h, c), h

    init = (jnp.zeros((B, H), jnp.float32), jnp.zeros((B, H), jnp.float32))
    (h_T, c_T), outs = jax.lax.scan(step, init, x)
    hs.append(h_T)
    cs.append(c_T)
    x = outs   # inter-layer dropout is identity in eval mode
  return jnp.stack(hs), jnp.stack(cs)


if __name__ == "__main__":
  input_dim = 16    # vocab size
  emb_dim = 32
  hid_dim = 32
  n_layers = 2
  dropout_prop = 0.5   # identity in eval-mode forward
  seq_len = 8
  batch = 2

  key = jax.random.PRNGKey(0)
  pkey, tkey = jax.random.split(key)
  raw_params = init_encoder_params(pkey, input_dim, emb_dim, hid_dim, n_layers)
  packed_params = pack_encoder_params(raw_params, compute_dtype=jnp.float32)
  tokens = jax.random.randint(tkey, (seq_len, batch), 0, input_dim,
                              dtype=jnp.int32)

  hidden, cell = encoder_forward(packed_params, tokens)
  jax.block_until_ready((hidden, cell))

  assert hidden.shape == (n_layers, batch, hid_dim)
  assert cell.shape == (n_layers, batch, hid_dim)
  assert jnp.all(jnp.isfinite(hidden)) and jnp.all(jnp.isfinite(cell))

  # Numerical check against a pure-JAX LSTM reference.
  h_ref, c_ref = encoder_forward_reference(raw_params, tokens)
  assert jnp.allclose(hidden, h_ref, atol=1e-2, rtol=1e-2), (
      float(jnp.max(jnp.abs(hidden - h_ref))))
  assert jnp.allclose(cell, c_ref, atol=1e-2, rtol=1e-2), (
      float(jnp.max(jnp.abs(cell - c_ref))))

  print("KERNEL_OK")
</pallas_src>

<mosaic_0001>
module attributes {stable_mosaic.version = 11 : i64} {
  func.func @_encoder_lstm_kernel(%arg0: memref<8x8x32xf32, #tpu.memory_space<vmem>>, %arg1: memref<2x32x128xf32, #tpu.memory_space<vmem>>, %arg2: memref<2x32x128xf32, #tpu.memory_space<vmem>>, %arg3: memref<2x1x128xf32, #tpu.memory_space<vmem>>, %arg4: memref<2x8x32xf32, #tpu.memory_space<vmem>>, %arg5: memref<2x8x32xf32, #tpu.memory_space<vmem>>, %arg6: memref<8x8x32xf32, #tpu.memory_space<vmem>>, %arg7: memref<8x8x128xf32, #tpu.memory_space<vmem>>) attributes {dimension_semantics = [], scalar_prefetch = 0 : i64, scratch_operands = 2 : i64, tpu.core_type = #tpu.core_type<tc>} {
    %c0 = arith.constant 0 : index
    %c0_0 = arith.constant 0 : index
    %c0_1 = arith.constant 0 : index
    %0 = vector.load %arg1[%c0, %c0_0, %c0_1] : memref<2x32x128xf32, #tpu.memory_space<vmem>>, vector<1x32x128xf32>
    %1 = vector.shape_cast %0 : vector<1x32x128xf32> to vector<32x128xf32>
    %c0_2 = arith.constant 0 : index
    %c0_3 = arith.constant 0 : index
    %c0_4 = arith.constant 0 : index
    %2 = vector.load %arg2[%c0_2, %c0_3, %c0_4] : memref<2x32x128xf32, #tpu.memory_space<vmem>>, vector<1x32x128xf32>
    %3 = vector.shape_cast %2 : vector<1x32x128xf32> to vector<32x128xf32>
    %c0_5 = arith.constant 0 : index
    %c0_6 = arith.constant 0 : index
    %c0_7 = arith.constant 0 : index
    %4 = vector.load %arg3[%c0_5, %c0_6, %c0_7] : memref<2x1x128xf32, #tpu.memory_space<vmem>>, vector<1x1x128xf32>
    %5 = vector.shape_cast %4 : vector<1x1x128xf32> to vector<1x128xf32>
    %c0_8 = arith.constant 0 : index
    %c0_9 = arith.constant 0 : index
    %c0_10 = arith.constant 0 : index
    %6 = vector.load %arg0[%c0_8, %c0_9, %c0_10] : memref<8x8x32xf32, #tpu.memory_space<vmem>>, vector<8x8x32xf32>
    %7 = vector.shape_cast %6 : vector<8x8x32xf32> to vector<64x32xf32>
    %cst = arith.constant dense<0.000000e+00> : vector<64x128xf32>
    %8 = tpu.matmul %7, %1, %cst {dimension_numbers = #tpu.dot_dimension_numbers<[1], [0], [0], [1], [0, 0, 1, 1], [], []>} : vector<64x32xf32>, vector<32x128xf32>, vector<64x128xf32> -> vector<64x128xf32>
    %9 = vector.broadcast %5 : vector<1x128xf32> to vector<64x128xf32>
    %10 = arith.addf %8, %9 : vector<64x128xf32>
    %11 = vector.shape_cast %10 : vector<64x128xf32> to vector<8x8x128xf32>
    %c0_11 = arith.constant 0 : index
    %c0_12 = arith.constant 0 : index
    %c0_13 = arith.constant 0 : index
    %12 = vector.load %arg7[%c0_11, %c0_12, %c0_13] : memref<8x8x128xf32, #tpu.memory_space<vmem>>, vector<8x8x128xf32>
    tpu.vector_store %arg7[%c0_11, %c0_12, %c0_13], %11 {strides = array<i32>} : memref<8x8x128xf32, #tpu.memory_space<vmem>>, vector<8x8x128xf32>,
    %cst_14 = arith.constant 0.000000e+00 : f32
    %13 = vector.broadcast %cst_14 : f32 to vector<8x32xf32>
    %cst_15 = arith.constant 0.000000e+00 : f32
    %14 = vector.broadcast %cst_15 : f32 to vector<8x32xf32>
    %c0_i32 = arith.constant 0 : i32
    %15 = arith.index_cast %c0_i32 : i32 to index
    %c0_16 = arith.constant 0 : index
    %c0_17 = arith.constant 0 : index
    %16 = vector.load %arg7[%15, %c0_16, %c0_17] : memref<8x8x128xf32, #tpu.memory_space<vmem>>, vector<1x8x128xf32>
    %17 = vector.shape_cast %16 : vector<1x8x128xf32> to vector<8x128xf32>
    %cst_18 = arith.constant dense<0.000000e+00> : vector<8x128xf32>
    %18 = tpu.matmul %13, %3, %cst_18 {dimension_numbers = #tpu.dot_dimension_numbers<[1], [0], [0], [1], [0, 0, 1, 1], [], []>} : vector<8x32xf32>, vector<32x128xf32>, vector<8x128xf32> -> vector<8x128xf32>
    %19 = arith.addf %17, %18 : vector<8x128xf32>
    %20 = arith.negf %19 : vector<8x128xf32>
    %21 = math.exp %20 : vector<8x128xf32>
    %cst_19 = arith.constant 1.000000e+00 : f32
    %22 = vector.broadcast %cst_19 : f32 to vector<8x128xf32>
    %23 = arith.addf %22, %21 : vector<8x128xf32>
    %24 = arith.divf %22, %23 : vector<8x128xf32>
    %25 = vector.extract_strided_slice %24 {offsets = [0, 0], sizes = [8, 32], strides = [1, 1]} : vector<8x128xf32> to vector<8x32xf32>
    %26 = vector.extract_strided_slice %24 {offsets = [0, 32], sizes = [8, 32], strides = [1, 1]} : vector<8x128xf32> to vector<8x32xf32>
    %27 = vector.extract_strided_slice %24 {offsets = [0, 64], sizes = [8, 32], strides = [1, 1]} : vector<8x128xf32> to vector<8x32xf32>
    %cst_20 = arith.constant 2.000000e+00 : f32
    %28 = vector.broadcast %cst_20 : f32 to vector<8x32xf32>
    %29 = arith.mulf %28, %27 : vector<8x32xf32>
    %cst_21 = arith.constant 1.000000e+00 : f32
    %30 = vector.broadcast %cst_21 : f32 to vector<8x32xf32>
    %31 = arith.subf %29, %30 : vector<8x32xf32>
    %32 = vector.extract_strided_slice %24 {offsets = [0, 96], sizes = [8, 32], strides = [1, 1]} : vector<8x128xf32> to vector<8x32xf32>
    %33 = arith.mulf %26, %14 : vector<8x32xf32>
    %34 = arith.mulf %25, %31 : vector<8x32xf32>
    %35 = arith.addf %33, %34 : vector<8x32xf32>
    %36 = math.tanh %35 : vector<8x32xf32>
    %37 = arith.mulf %32, %36 : vector<8x32xf32>
    %38 = arith.index_cast %c0_i32 : i32 to index
    %c0_22 = arith.constant 0 : index
    %c0_23 = arith.constant 0 : index
    %39 = vector.load %arg6[%38, %c0_22, %c0_23] : memref<8x8x32xf32, #tpu.memory_space<vmem>>, vector<1x8x32xf32>
    %40 = vector.shape_cast %39 : vector<1x8x32xf32> to vector<8x32xf32>
    %41 = vector.shape_cast %37 : vector<8x32xf32> to vector<1x8x32xf32>
    tpu.vector_store %arg6[%38, %c0_22, %c0_23], %41 {strides = array<i32>} : memref<8x8x32xf32, #tpu.memory_space<vmem>>, vector<1x8x32xf32>,
    %c1_i32 = arith.constant 1 : i32
    %42 = arith.index_cast %c1_i32 : i32 to index
    %c0_24 = arith.constant 0 : index
    %c0_25 = arith.constant 0 : index
    %43 = vector.load %arg7[%42, %c0_24, %c0_25] : memref<8x8x128xf32, #tpu.memory_space<vmem>>, vector<1x8x128xf32>
    %44 = vector.shape_cast %43 : vector<1x8x128xf32> to vector<8x128xf32>
    %cst_26 = arith.constant dense<0.000000e+00> : vector<8x128xf32>
    %45 = tpu.matmul %37, %3, %cst_26 {dimension_numbers = #tpu.dot_dimension_numbers<[1], [0], [0], [1], [0, 0, 1, 1], [], []>} : vector<8x32xf32>, vector<32x128xf32>, vector<8x128xf32> -> vector<8x128xf32>
    %46 = arith.addf %44, %45 : vector<8x128xf32>
    %47 = arith.negf %46 : vector<8x128xf32>
    %48 = math.exp %47 : vector<8x128xf32>
    %cst_27 = arith.constant 1.000000e+00 : f32
    %49 = vector.broadcast %cst_27 : f32 to vector<8x128xf32>
    %50 = arith.addf %49, %48 : vector<8x128xf32>
    %51 = arith.divf %49, %50 : vector<8x128xf32>
    %52 = vector.extract_strided_slice %51 {offsets = [0, 0], sizes = [8, 32], strides = [1, 1]} : vector<8x128xf32> to vector<8x32xf32>
    %53 = vector.extract_strided_slice %51 {offsets = [0, 32], sizes = [8, 32], strides = [1, 1]} : vector<8x128xf32> to vector<8x32xf32>
    %54 = vector.extract_strided_slice %51 {offsets = [0, 64], sizes = [8, 32], strides = [1, 1]} : vector<8x128xf32> to vector<8x32xf32>
    %cst_28 = arith.constant 2.000000e+00 : f32
    %55 = vector.broadcast %cst_28 : f32 to vector<8x32xf32>
    %56 = arith.mulf %55, %54 : vector<8x32xf32>
    %cst_29 = arith.constant 1.000000e+00 : f32
    %57 = vector.broadcast %cst_29 : f32 to vector<8x32xf32>
    %58 = arith.subf %56, %57 : vector<8x32xf32>
    %59 = vector.extract_strided_slice %51 {offsets = [0, 96], sizes = [8, 32], strides = [1, 1]} : vector<8x128xf32> to vector<8x32xf32>
    %60 = arith.mulf %53, %35 : vector<8x32xf32>
    %61 = arith.mulf %52, %58 : vector<8x32xf32>
    %62 = arith.addf %60, %61 : vector<8x32xf32>
    %63 = math.tanh %62 : vector<8x32xf32>
    %64 = arith.mulf %59, %63 : vector<8x32xf32>
    %65 = arith.index_cast %c1_i32 : i32 to index
    %c0_30 = arith.constant 0 : index
    %c0_31 = arith.constant 0 : index
    %66 = vector.load %arg6[%65, %c0_30, %c0_31] : memref<8x8x32xf32, #tpu.memory_space<vmem>>, vector<1x8x32xf32>
    %67 = vector.shape_cast %66 : vector<1x8x32xf32> to vector<8x32xf32>
    %68 = vector.shape_cast %64 : vector<8x32xf32> to vector<1x8x32xf32>
    tpu.vector_store %arg6[%65, %c0_30, %c0_31], %68 {strides = array<i32>} : memref<8x8x32xf32, #tpu.memory_space<vmem>>, vector<1x8x32xf32>,
    %c2_i32 = arith.constant 2 : i32
    %69 = arith.index_cast %c2_i32 : i32 to index
    %c0_32 = arith.constant 0 : index
    %c0_33 = arith.constant 0 : index
    %70 = vector.load %arg7[%69, %c0_32, %c0_33] : memref<8x8x128xf32, #tpu.memory_space<vmem>>, vector<1x8x128xf32>
    %71 = vector.shape_cast %70 : vector<1x8x128xf32> to vector<8x128xf32>
    %cst_34 = arith.constant dense<0.000000e+00> : vector<8x128xf32>
    %72 = tpu.matmul %64, %3, %cst_34 {dimension_numbers = #tpu.dot_dimension_numbers<[1], [0], [0], [1], [0, 0, 1, 1], [], []>} : vector<8x32xf32>, vector<32x128xf32>, vector<8x128xf32> -> vector<8x128xf32>
    %73 = arith.addf %71, %72 : vector<8x128xf32>
    %74 = arith.negf %73 : vector<8x128xf32>
    %75 = math.exp %74 : vector<8x128xf32>
    %cst_35 = arith.constant 1.000000e+00 : f32
    %76 = vector.broadcast %cst_35 : f32 to vector<8x128xf32>
    %77 = arith.addf %76, %75 : vector<8x128xf32>
    %78 = arith.divf %76, %77 : vector<8x128xf32>
    %79 = vector.extract_strided_slice %78 {offsets = [0, 0], sizes = [8, 32], strides = [1, 1]} : vector<8x128xf32> to vector<8x32xf32>
    %80 = vector.extract_strided_slice %78 {offsets = [0, 32], sizes = [8, 32], strides = [1, 1]} : vector<8x128xf32> to vector<8x32xf32>
    %81 = vector.extract_strided_slice %78 {offsets = [0, 64], sizes = [8, 32], strides = [1, 1]} : vector<8x128xf32> to vector<8x32xf32>
    %cst_36 = arith.constant 2.000000e+00 : f32
    %82 = vector.broadcast %cst_36 : f32 to vector<8x32xf32>
    %83 = arith.mulf %82, %81 : vector<8x32xf32>
    %cst_37 = arith.constant 1.000000e+00 : f32
    %84 = vector.broadcast %cst_37 : f32 to vector<8x32xf32>
    %85 = arith.subf %83, %84 : vector<8x32xf32>
    %86 = vector.extract_strided_slice %78 {offsets = [0, 96], sizes = [8, 32], strides = [1, 1]} : vector<8x128xf32> to vector<8x32xf32>
    %87 = arith.mulf %80, %62 : vector<8x32xf32>
    %88 = arith.mulf %79, %85 : vector<8x32xf32>
    %89 = arith.addf %87, %88 : vector<8x32xf32>
    %90 = math.tanh %89 : vector<8x32xf32>
    %91 = arith.mulf %86, %90 : vector<8x32xf32>
    %92 = arith.index_cast %c2_i32 : i32 to index
    %c0_38 = arith.constant 0 : index
    %c0_39 = arith.constant 0 : index
    %93 = vector.load %arg6[%92, %c0_38, %c0_39] : memref<8x8x32xf32, #tpu.memory_space<vmem>>, vector<1x8x32xf32>
    %94 = vector.shape_cast %93 : vector<1x8x32xf32> to vector<8x32xf32>
    %95 = vector.shape_cast %91 : vector<8x32xf32> to vector<1x8x32xf32>
    tpu.vector_store %arg6[%92, %c0_38, %c0_39], %95 {strides = array<i32>} : memref<8x8x32xf32, #tpu.memory_space<vmem>>, vector<1x8x32xf32>,
    %c3_i32 = arith.constant 3 : i32
    %96 = arith.index_cast %c3_i32 : i32 to index
    %c0_40 = arith.constant 0 : index
    %c0_41 = arith.constant 0 : index
    %97 = vector.load %arg7[%96, %c0_40, %c0_41] : memref<8x8x128xf32, #tpu.memory_space<vmem>>, vector<1x8x128xf32>
    %98 = vector.shape_cast %97 : vector<1x8x128xf32> to vector<8x128xf32>
    %cst_42 = arith.constant dense<0.000000e+00> : vector<8x128xf32>
    %99 = tpu.matmul %91, %3, %cst_42 {dimension_numbers = #tpu.dot_dimension_numbers<[1], [0], [0], [1], [0, 0, 1, 1], [], []>} : vector<8x32xf32>, vector<32x128xf32>, vector<8x128xf32> -> vector<8x128xf32>
    %100 = arith.addf %98, %99 : vector<8x128xf32>
    %101 = arith.negf %100 : vector<8x128xf32>
    %102 = math.exp %101 : vector<8x128xf32>
    %cst_43 = arith.constant 1.000000e+00 : f32
    %103 = vector.broadcast %cst_43 : f32 to vector<8x128xf32>
    %104 = arith.addf %103, %102 : vector<8x128xf32>
    %105 = arith.divf %103, %104 : vector<8x128xf32>
    %106 = vector.extract_strided_slice %105 {offsets = [0, 0], sizes = [8, 32], strides = [1, 1]} : vector<8x128xf32> to vector<8x32xf32>
    %107 = vector.extract_strided_slice %105 {offsets = [0, 32], sizes = [8, 32], strides = [1, 1]} : vector<8x128xf32> to vector<8x32xf32>
    %108 = vector.extract_strided_slice %105 {offsets = [0, 64], sizes = [8, 32], strides = [1, 1]} : vector<8x128xf32> to vector<8x32xf32>
    %cst_44 = arith.constant 2.000000e+00 : f32
    %109 = vector.broadcast %cst_44 : f32 to vector<8x32xf32>
    %110 = arith.mulf %109, %108 : vector<8x32xf32>
    %cst_45 = arith.constant 1.000000e+00 : f32
    %111 = vector.broadcast %cst_45 : f32 to vector<8x32xf32>
    %112 = arith.subf %110, %111 : vector<8x32xf32>
    %113 = vector.extract_strided_slice %105 {offsets = [0, 96], sizes = [8, 32], strides = [1, 1]} : vector<8x128xf32> to vector<8x32xf32>
    %114 = arith.mulf %107, %89 : vector<8x32xf32>
    %115 = arith.mulf %106, %112 : vector<8x32xf32>
    %116 = arith.addf %114, %115 : vector<8x32xf32>
    %117 = math.tanh %116 : vector<8x32xf32>
    %118 = arith.mulf %113, %117 : vector<8x32xf32>
    %119 = arith.index_cast %c3_i32 : i32 to index
    %c0_46 = arith.constant 0 : index
    %c0_47 = arith.constant 0 : index
    %120 = vector.load %arg6[%119, %c0_46, %c0_47] : memref<8x8x32xf32, #tpu.memory_space<vmem>>, vector<1x8x32xf32>
    %121 = vector.shape_cast %120 : vector<1x8x32xf32> to vector<8x32xf32>
    %122 = vector.shape_cast %118 : vector<8x32xf32> to vector<1x8x32xf32>
    tpu.vector_store %arg6[%119, %c0_46, %c0_47], %122 {strides = array<i32>} : memref<8x8x32xf32, #tpu.memory_space<vmem>>, vector<1x8x32xf32>,
    %c4_i32 = arith.constant 4 : i32
    %123 = arith.index_cast %c4_i32 : i32 to index
    %c0_48 = arith.constant 0 : index
    %c0_49 = arith.constant 0 : index
    %124 = vector.load %arg7[%123, %c0_48, %c0_49] : memref<8x8x128xf32, #tpu.memory_space<vmem>>, vector<1x8x128xf32>
    %125 = vector.shape_cast %124 : vector<1x8x128xf32> to vector<8x128xf32>
    %cst_50 = arith.constant dense<0.000000e+00> : vector<8x128xf32>
    %126 = tpu.matmul %118, %3, %cst_50 {dimension_numbers = #tpu.dot_dimension_numbers<[1], [0], [0], [1], [0, 0, 1, 1], [], []>} : vector<8x32xf32>, vector<32x128xf32>, vector<8x128xf32> -> vector<8x128xf32>
    %127 = arith.addf %125, %126 : vector<8x128xf32>
    %128 = arith.negf %127 : vector<8x128xf32>
    %129 = math.exp %128 : vector<8x128xf32>
    %cst_51 = arith.constant 1.000000e+00 : f32
    %130 = vector.broadcast %cst_51 : f32 to vector<8x128xf32>
    %131 = arith.addf %130, %129 : vector<8x128xf32>
    %132 = arith.divf %130, %131 : vector<8x128xf32>
    %133 = vector.extract_strided_slice %132 {offsets = [0, 0], sizes = [8, 32], strides = [1, 1]} : vector<8x128xf32> to vector<8x32xf32>
    %134 = vector.extract_strided_slice %132 {offsets = [0, 32], sizes = [8, 32], strides = [1, 1]} : vector<8x128xf32> to vector<8x32xf32>
    %135 = vector.extract_strided_slice %132 {offsets = [0, 64], sizes = [8, 32], strides = [1, 1]} : vector<8x128xf32> to vector<8x32xf32>
    %cst_52 = arith.constant 2.000000e+00 : f32
    %136 = vector.broadcast %cst_52 : f32 to vector<8x32xf32>
    %137 = arith.mulf %136, %135 : vector<8x32xf32>
    %cst_53 = arith.constant 1.000000e+00 : f32
    %138 = vector.broadcast %cst_53 : f32 to vector<8x32xf32>
    %139 = arith.subf %137, %138 : vector<8x32xf32>
    %140 = vector.extract_strided_slice %132 {offsets = [0, 96], sizes = [8, 32], strides = [1, 1]} : vector<8x128xf32> to vector<8x32xf32>
    %141 = arith.mulf %134, %116 : vector<8x32xf32>
    %142 = arith.mulf %133, %139 : vector<8x32xf32>
    %143 = arith.addf %141, %142 : vector<8x32xf32>
    %144 = math.tanh %143 : vector<8x32xf32>
    %145 = arith.mulf %140, %144 : vector<8x32xf32>
    %146 = arith.index_cast %c4_i32 : i32 to index
    %c0_54 = arith.constant 0 : index
    %c0_55 = arith.constant 0 : index
    %147 = vector.load %arg6[%146, %c0_54, %c0_55] : memref<8x8x32xf32, #tpu.memory_space<vmem>>, vector<1x8x32xf32>
    %148 = vector.shape_cast %147 : vector<1x8x32xf32> to vector<8x32xf32>
    %149 = vector.shape_cast %145 : vector<8x32xf32> to vector<1x8x32xf32>
    tpu.vector_store %arg6[%146, %c0_54, %c0_55], %149 {strides = array<i32>} : memref<8x8x32xf32, #tpu.memory_space<vmem>>, vector<1x8x32xf32>,
    %c5_i32 = arith.constant 5 : i32
    %150 = arith.index_cast %c5_i32 : i32 to index
    %c0_56 = arith.constant 0 : index
    %c0_57 = arith.constant 0 : index
    %151 = vector.load %arg7[%150, %c0_56, %c0_57] : memref<8x8x128xf32, #tpu.memory_space<vmem>>, vector<1x8x128xf32>
    %152 = vector.shape_cast %151 : vector<1x8x128xf32> to vector<8x128xf32>
    %cst_58 = arith.constant dense<0.000000e+00> : vector<8x128xf32>
    %153 = tpu.matmul %145, %3, %cst_58 {dimension_numbers = #tpu.dot_dimension_numbers<[1], [0], [0], [1], [0, 0, 1, 1], [], []>} : vector<8x32xf32>, vector<32x128xf32>, vector<8x128xf32> -> vector<8x128xf32>
    %154 = arith.addf %152, %153 : vector<8x128xf32>
    %155 = arith.negf %154 : vector<8x128xf32>
    %156 = math.exp %155 : vector<8x128xf32>
    %cst_59 = arith.constant 1.000000e+00 : f32
    %157 = vector.broadcast %cst_59 : f32 to vector<8x128xf32>
    %158 = arith.addf %157, %156 : vector<8x128xf32>
    %159 = arith.divf %157, %158 : vector<8x128xf32>
    %160 = vector.extract_strided_slice %159 {offsets = [0, 0], sizes = [8, 32], strides = [1, 1]} : vector<8x128xf32> to vector<8x32xf32>
    %161 = vector.extract_strided_slice %159 {offsets = [0, 32], sizes = [8, 32], strides = [1, 1]} : vector<8x128xf32> to vector<8x32xf32>
    %162 = vector.extract_strided_slice %159 {offsets = [0, 64], sizes = [8, 32], strides = [1, 1]} : vector<8x128xf32> to vector<8x32xf32>
    %cst_60 = arith.constant 2.000000e+00 : f32
    %163 = vector.broadcast %cst_60 : f32 to vector<8x32xf32>
    %164 = arith.mulf %163, %162 : vector<8x32xf32>
    %cst_61 = arith.constant 1.000000e+00 : f32
    %165 = vector.broadcast %cst_61 : f32 to vector<8x32xf32>
    %166 = arith.subf %164, %165 : vector<8x32xf32>
    %167 = vector.extract_strided_slice %159 {offsets = [0, 96], sizes = [8, 32], strides = [1, 1]} : vector<8x128xf32> to vector<8x32xf32>
    %168 = arith.mulf %161, %143 : vector<8x32xf32>
    %169 = arith.mulf %160, %166 : vector<8x32xf32>
    %170 = arith.addf %168, %169 : vector<8x32xf32>
    %171 = math.tanh %170 : vector<8x32xf32>
    %172 = arith.mulf %167, %171 : vector<8x32xf32>
    %173 = arith.index_cast %c5_i32 : i32 to index
    %c0_62 = arith.constant 0 : index
    %c0_63 = arith.constant 0 : index
    %174 = vector.load %arg6[%173, %c0_62, %c0_63] : memref<8x8x32xf32, #tpu.memory_space<vmem>>, vector<1x8x32xf32>
    %175 = vector.shape_cast %174 : vector<1x8x32xf32> to vector<8x32xf32>
    %176 = vector.shape_cast %172 : vector<8x32xf32> to vector<1x8x32xf32>
    tpu.vector_store %arg6[%173, %c0_62, %c0_63], %176 {strides = array<i32>} : memref<8x8x32xf32, #tpu.memory_space<vmem>>, vector<1x8x32xf32>,
    %c6_i32 = arith.constant 6 : i32
    %177 = arith.index_cast %c6_i32 : i32 to index
    %c0_64 = arith.constant 0 : index
    %c0_65 = arith.constant 0 : index
    %178 = vector.load %arg7[%177, %c0_64, %c0_65] : memref<8x8x128xf32, #tpu.memory_space<vmem>>, vector<1x8x128xf32>
    %179 = vector.shape_cast %178 : vector<1x8x128xf32> to vector<8x128xf32>
    %cst_66 = arith.constant dense<0.000000e+00> : vector<8x128xf32>
    %180 = tpu.matmul %172, %3, %cst_66 {dimension_numbers = #tpu.dot_dimension_numbers<[1], [0], [0], [1], [0, 0, 1, 1], [], []>} : vector<8x32xf32>, vector<32x128xf32>, vector<8x128xf32> -> vector<8x128xf32>
    %181 = arith.addf %179, %180 : vector<8x128xf32>
    %182 = arith.negf %181 : vector<8x128xf32>
    %183 = math.exp %182 : vector<8x128xf32>
    %cst_67 = arith.constant 1.000000e+00 : f32
    %184 = vector.broadcast %cst_67 : f32 to vector<8x128xf32>
    %185 = arith.addf %184, %183 : vector<8x128xf32>
    %186 = arith.divf %184, %185 : vector<8x128xf32>
    %187 = vector.extract_strided_slice %186 {offsets = [0, 0], sizes = [8, 32], strides = [1, 1]} : vector<8x128xf32> to vector<8x32xf32>
    %188 = vector.extract_strided_slice %186 {offsets = [0, 32], sizes = [8, 32], strides = [1, 1]} : vector<8x128xf32> to vector<8x32xf32>
    %189 = vector.extract_strided_slice %186 {offsets = [0, 64], sizes = [8, 32], strides = [1, 1]} : vector<8x128xf32> to vector<8x32xf32>
    %cst_68 = arith.constant 2.000000e+00 : f32
    %190 = vector.broadcast %cst_68 : f32 to vector<8x32xf32>
    %191 = arith.mulf %190, %189 : vector<8x32xf32>
    %cst_69 = arith.constant 1.000000e+00 : f32
    %192 = vector.broadcast %cst_69 : f32 to vector<8x32xf32>
    %193 = arith.subf %191, %192 : vector<8x32xf32>
    %194 = vector.extract_strided_slice %186 {offsets = [0, 96], sizes = [8, 32], strides = [1, 1]} : vector<8x128xf32> to vector<8x32xf32>
    %195 = arith.mulf %188, %170 : vector<8x32xf32>
    %196 = arith.mulf %187, %193 : vector<8x32xf32>
    %197 = arith.addf %195, %196 : vector<8x32xf32>
    %198 = math.tanh %197 : vector<8x32xf32>
    %199 = arith.mulf %194, %198 : vector<8x32xf32>
    %200 = arith.index_cast %c6_i32 : i32 to index
    %c0_70 = arith.constant 0 : index
    %c0_71 = arith.constant 0 : index
    %201 = vector.load %arg6[%200, %c0_70, %c0_71] : memref<8x8x32xf32, #tpu.memory_space<vmem>>, vector<1x8x32xf32>
    %202 = vector.shape_cast %201 : vector<1x8x32xf32> to vector<8x32xf32>
    %203 = vector.shape_cast %199 : vector<8x32xf32> to vector<1x8x32xf32>
    tpu.vector_store %arg6[%200, %c0_70, %c0_71], %203 {strides = array<i32>} : memref<8x8x32xf32, #tpu.memory_space<vmem>>, vector<1x8x32xf32>,
    %c7_i32 = arith.constant 7 : i32
    %204 = arith.index_cast %c7_i32 : i32 to index
    %c0_72 = arith.constant 0 : index
    %c0_73 = arith.constant 0 : index
    %205 = vector.load %arg7[%204, %c0_72, %c0_73] : memref<8x8x128xf32, #tpu.memory_space<vmem>>, vector<1x8x128xf32>
    %206 = vector.shape_cast %205 : vector<1x8x128xf32> to vector<8x128xf32>
    %cst_74 = arith.constant dense<0.000000e+00> : vector<8x128xf32>
    %207 = tpu.matmul %199, %3, %cst_74 {dimension_numbers = #tpu.dot_dimension_numbers<[1], [0], [0], [1], [0, 0, 1, 1], [], []>} : vector<8x32xf32>, vector<32x128xf32>, vector<8x128xf32> -> vector<8x128xf32>
    %208 = arith.addf %206, %207 : vector<8x128xf32>
    %209 = arith.negf %208 : vector<8x128xf32>
    %210 = math.exp %209 : vector<8x128xf32>
    %cst_75 = arith.constant 1.000000e+00 : f32
    %211 = vector.broadcast %cst_75 : f32 to vector<8x128xf32>
    %212 = arith.addf %211, %210 : vector<8x128xf32>
    %213 = arith.divf %211, %212 : vector<8x128xf32>
    %214 = vector.extract_strided_slice %213 {offsets = [0, 0], sizes = [8, 32], strides = [1, 1]} : vector<8x128xf32> to vector<8x32xf32>
    %215 = vector.extract_strided_slice %213 {offsets = [0, 32], sizes = [8, 32], strides = [1, 1]} : vector<8x128xf32> to vector<8x32xf32>
    %216 = vector.extract_strided_slice %213 {offsets = [0, 64], sizes = [8, 32], strides = [1, 1]} : vector<8x128xf32> to vector<8x32xf32>
    %cst_76 = arith.constant 2.000000e+00 : f32
    %217 = vector.broadcast %cst_76 : f32 to vector<8x32xf32>
    %218 = arith.mulf %217, %216 : vector<8x32xf32>
    %cst_77 = arith.constant 1.000000e+00 : f32
    %219 = vector.broadcast %cst_77 : f32 to vector<8x32xf32>
    %220 = arith.subf %218, %219 : vector<8x32xf32>
    %221 = vector.extract_strided_slice %213 {offsets = [0, 96], sizes = [8, 32], strides = [1, 1]} : vector<8x128xf32> to vector<8x32xf32>
    %222 = arith.mulf %215, %197 : vector<8x32xf32>
    %223 = arith.mulf %214, %220 : vector<8x32xf32>
    %224 = arith.addf %222, %223 : vector<8x32xf32>
    %225 = math.tanh %224 : vector<8x32xf32>
    %226 = arith.mulf %221, %225 : vector<8x32xf32>
    %227 = arith.index_cast %c7_i32 : i32 to index
    %c0_78 = arith.constant 0 : index
    %c0_79 = arith.constant 0 : index
    %228 = vector.load %arg6[%227, %c0_78, %c0_79] : memref<8x8x32xf32, #tpu.memory_space<vmem>>, vector<1x8x32xf32>
    %229 = vector.shape_cast %228 : vector<1x8x32xf32> to vector<8x32xf32>
    %230 = vector.shape_cast %226 : vector<8x32xf32> to vector<1x8x32xf32>
    tpu.vector_store %arg6[%227, %c0_78, %c0_79], %230 {strides = array<i32>} : memref<8x8x32xf32, #tpu.memory_space<vmem>>, vector<1x8x32xf32>,
    %c8_i32 = arith.constant 8 : i32
    %c0_80 = arith.constant 0 : index
    %c0_81 = arith.constant 0 : index
    %c0_82 = arith.constant 0 : index
    %231 = vector.load %arg4[%c0_80, %c0_81, %c0_82] : memref<2x8x32xf32, #tpu.memory_space<vmem>>, vector<1x8x32xf32>
    %232 = vector.shape_cast %231 : vector<1x8x32xf32> to vector<8x32xf32>
    %233 = vector.shape_cast %226 : vector<8x32xf32> to vector<1x8x32xf32>
    tpu.vector_store %arg4[%c0_80, %c0_81, %c0_82], %233 {strides = array<i32>} : memref<2x8x32xf32, #tpu.memory_space<vmem>>, vector<1x8x32xf32>,
    %c0_83 = arith.constant 0 : index
    %c0_84 = arith.constant 0 : index
    %c0_85 = arith.constant 0 : index
    %234 = vector.load %arg5[%c0_83, %c0_84, %c0_85] : memref<2x8x32xf32, #tpu.memory_space<vmem>>, vector<1x8x32xf32>
    %235 = vector.shape_cast %234 : vector<1x8x32xf32> to vector<8x32xf32>
    %236 = vector.shape_cast %224 : vector<8x32xf32> to vector<1x8x32xf32>
    tpu.vector_store %arg5[%c0_83, %c0_84, %c0_85], %236 {strides = array<i32>} : memref<2x8x32xf32, #tpu.memory_space<vmem>>, vector<1x8x32xf32>,
    %c1 = arith.constant 1 : index
    %c0_86 = arith.constant 0 : index
    %c0_87 = arith.constant 0 : index
    %237 = vector.load %arg1[%c1, %c0_86, %c0_87] : memref<2x32x128xf32, #tpu.memory_space<vmem>>, vector<1x32x128xf32>
    %238 = vector.shape_cast %237 : vector<1x32x128xf32> to vector<32x128xf32>
    %c1_88 = arith.constant 1 : index
    %c0_89 = arith.constant 0 : index
    %c0_90 = arith.constant 0 : index
    %239 = vector.load %arg2[%c1_88, %c0_89, %c0_90] : memref<2x32x128xf32, #tpu.memory_space<vmem>>, vector<1x32x128xf32>
    %240 = vector.shape_cast %239 : vector<1x32x128xf32> to vector<32x128xf32>
    %c1_91 = arith.constant 1 : index
    %c0_92 = arith.constant 0 : index
    %c0_93 = arith.constant 0 : index
    %241 = vector.load %arg3[%c1_91, %c0_92, %c0_93] : memref<2x1x128xf32, #tpu.memory_space<vmem>>, vector<1x1x128xf32>
    %242 = vector.shape_cast %241 : vector<1x1x128xf32> to vector<1x128xf32>
    %c0_94 = arith.constant 0 : index
    %c0_95 = arith.constant 0 : index
    %c0_96 = arith.constant 0 : index
    %243 = vector.load %arg6[%c0_94, %c0_95, %c0_96] : memref<8x8x32xf32, #tpu.memory_space<vmem>>, vector<8x8x32xf32>
    %244 = vector.shape_cast %243 : vector<8x8x32xf32> to vector<64x32xf32>
    %cst_97 = arith.constant dense<0.000000e+00> : vector<64x128xf32>
    %245 = tpu.matmul %244, %238, %cst_97 {dimension_numbers = #tpu.dot_dimension_numbers<[1], [0], [0], [1], [0, 0, 1, 1], [], []>} : vector<64x32xf32>, vector<32x128xf32>, vector<64x128xf32> -> vector<64x128xf32>
    %246 = vector.broadcast %242 : vector<1x128xf32> to vector<64x128xf32>
    %247 = arith.addf %245, %246 : vector<64x128xf32>
    %248 = vector.shape_cast %247 : vector<64x128xf32> to vector<8x8x128xf32>
    %c0_98 = arith.constant 0 : index
    %c0_99 = arith.constant 0 : index
    %c0_100 = arith.constant 0 : index
    %249 = vector.load %arg7[%c0_98, %c0_99, %c0_100] : memref<8x8x128xf32, #tpu.memory_space<vmem>>, vector<8x8x128xf32>
    tpu.vector_store %arg7[%c0_98, %c0_99, %c0_100], %248 {strides = array<i32>} : memref<8x8x128xf32, #tpu.memory_space<vmem>>, vector<8x8x128xf32>,
    %cst_101 = arith.constant 0.000000e+00 : f32
    %250 = vector.broadcast %cst_101 : f32 to vector<8x32xf32>
    %cst_102 = arith.constant 0.000000e+00 : f32
    %251 = vector.broadcast %cst_102 : f32 to vector<8x32xf32>
    %c0_i32_103 = arith.constant 0 : i32
    %252 = arith.index_cast %c0_i32_103 : i32 to index
    %c0_104 = arith.constant 0 : index
    %c0_105 = arith.constant 0 : index
    %253 = vector.load %arg7[%252, %c0_104, %c0_105] : memref<8x8x128xf32, #tpu.memory_space<vmem>>, vector<1x8x128xf32>
    %254 = vector.shape_cast %253 : vector<1x8x128xf32> to vector<8x128xf32>
    %cst_106 = arith.constant dense<0.000000e+00> : vector<8x128xf32>
    %255 = tpu.matmul %250, %240, %cst_106 {dimension_numbers = #tpu.dot_dimension_numbers<[1], [0], [0], [1], [0, 0, 1, 1], [], []>} : vector<8x32xf32>, vector<32x128xf32>, vector<8x128xf32> -> vector<8x128xf32>
    %256 = arith.addf %254, %255 : vector<8x128xf32>
    %257 = arith.negf %256 : vector<8x128xf32>
    %258 = math.exp %257 : vector<8x128xf32>
    %cst_107 = arith.constant 1.000000e+00 : f32
    %259 = vector.broadcast %cst_107 : f32 to vector<8x128xf32>
    %260 = arith.addf %259, %258 : vector<8x128xf32>
    %261 = arith.divf %259, %260 : vector<8x128xf32>
    %262 = vector.extract_strided_slice %261 {offsets = [0, 0], sizes = [8, 32], strides = [1, 1]} : vector<8x128xf32> to vector<8x32xf32>
    %263 = vector.extract_strided_slice %261 {offsets = [0, 32], sizes = [8, 32], strides = [1, 1]} : vector<8x128xf32> to vector<8x32xf32>
    %264 = vector.extract_strided_slice %261 {offsets = [0, 64], sizes = [8, 32], strides = [1, 1]} : vector<8x128xf32> to vector<8x32xf32>
    %cst_108 = arith.constant 2.000000e+00 : f32
    %265 = vector.broadcast %cst_108 : f32 to vector<8x32xf32>
    %266 = arith.mulf %265, %264 : vector<8x32xf32>
    %cst_109 = arith.constant 1.000000e+00 : f32
    %267 = vector.broadcast %cst_109 : f32 to vector<8x32xf32>
    %268 = arith.subf %266, %267 : vector<8x32xf32>
    %269 = vector.extract_strided_slice %261 {offsets = [0, 96], sizes = [8, 32], strides = [1, 1]} : vector<8x128xf32> to vector<8x32xf32>
    %270 = arith.mulf %263, %251 : vector<8x32xf32>
    %271 = arith.mulf %262, %268 : vector<8x32xf32>
    %272 = arith.addf %270, %271 : vector<8x32xf32>
    %273 = math.tanh %272 : vector<8x32xf32>
    %274 = arith.mulf %269, %273 : vector<8x32xf32>
    %c1_i32_110 = arith.constant 1 : i32
    %275 = arith.index_cast %c1_i32_110 : i32 to index
    %c0_111 = arith.constant 0 : index
    %c0_112 = arith.constant 0 : index
    %276 = vector.load %arg7[%275, %c0_111, %c0_112] : memref<8x8x128xf32, #tpu.memory_space<vmem>>, vector<1x8x128xf32>
    %277 = vector.shape_cast %276 : vector<1x8x128xf32> to vector<8x128xf32>
    %cst_113 = arith.constant dense<0.000000e+00> : vector<8x128xf32>
    %278 = tpu.matmul %274, %240, %cst_113 {dimension_numbers = #tpu.dot_dimension_numbers<[1], [0], [0], [1], [0, 0, 1, 1], [], []>} : vector<8x32xf32>, vector<32x128xf32>, vector<8x128xf32> -> vector<8x128xf32>
    %279 = arith.addf %277, %278 : vector<8x128xf32>
    %280 = arith.negf %279 : vector<8x128xf32>
    %281 = math.exp %280 : vector<8x128xf32>
    %cst_114 = arith.constant 1.000000e+00 : f32
    %282 = vector.broadcast %cst_114 : f32 to vector<8x128xf32>
    %283 = arith.addf %282, %281 : vector<8x128xf32>
    %284 = arith.divf %282, %283 : vector<8x128xf32>
    %285 = vector.extract_strided_slice %284 {offsets = [0, 0], sizes = [8, 32], strides = [1, 1]} : vector<8x128xf32> to vector<8x32xf32>
    %286 = vector.extract_strided_slice %284 {offsets = [0, 32], sizes = [8, 32], strides = [1, 1]} : vector<8x128xf32> to vector<8x32xf32>
    %287 = vector.extract_strided_slice %284 {offsets = [0, 64], sizes = [8, 32], strides = [1, 1]} : vector<8x128xf32> to vector<8x32xf32>
    %cst_115 = arith.constant 2.000000e+00 : f32
    %288 = vector.broadcast %cst_115 : f32 to vector<8x32xf32>
    %289 = arith.mulf %288, %287 : vector<8x32xf32>
    %cst_116 = arith.constant 1.000000e+00 : f32
    %290 = vector.broadcast %cst_116 : f32 to vector<8x32xf32>
    %291 = arith.subf %289, %290 : vector<8x32xf32>
    %292 = vector.extract_strided_slice %284 {offsets = [0, 96], sizes = [8, 32], strides = [1, 1]} : vector<8x128xf32> to vector<8x32xf32>
    %293 = arith.mulf %286, %272 : vector<8x32xf32>
    %294 = arith.mulf %285, %291 : vector<8x32xf32>
    %295 = arith.addf %293, %294 : vector<8x32xf32>
    %296 = math.tanh %295 : vector<8x32xf32>
    %297 = arith.mulf %292, %296 : vector<8x32xf32>
    %c2_i32_117 = arith.constant 2 : i32
    %298 = arith.index_cast %c2_i32_117 : i32 to index
    %c0_118 = arith.constant 0 : index
    %c0_119 = arith.constant 0 : index
    %299 = vector.load %arg7[%298, %c0_118, %c0_119] : memref<8x8x128xf32, #tpu.memory_space<vmem>>, vector<1x8x128xf32>
    %300 = vector.shape_cast %299 : vector<1x8x128xf32> to vector<8x128xf32>
    %cst_120 = arith.constant dense<0.000000e+00> : vector<8x128xf32>
    %301 = tpu.matmul %297, %240, %cst_120 {dimension_numbers = #tpu.dot_dimension_numbers<[1], [0], [0], [1], [0, 0, 1, 1], [], []>} : vector<8x32xf32>, vector<32x128xf32>, vector<8x128xf32> -> vector<8x128xf32>
    %302 = arith.addf %300, %301 : vector<8x128xf32>
    %303 = arith.negf %302 : vector<8x128xf32>
    %304 = math.exp %303 : vector<8x128xf32>
    %cst_121 = arith.constant 1.000000e+00 : f32
    %305 = vector.broadcast %cst_121 : f32 to vector<8x128xf32>
    %306 = arith.addf %305, %304 : vector<8x128xf32>
    %307 = arith.divf %305, %306 : vector<8x128xf32>
    %308 = vector.extract_strided_slice %307 {offsets = [0, 0], sizes = [8, 32], strides = [1, 1]} : vector<8x128xf32> to vector<8x32xf32>
    %309 = vector.extract_strided_slice %307 {offsets = [0, 32], sizes = [8, 32], strides = [1, 1]} : vector<8x128xf32> to vector<8x32xf32>
    %310 = vector.extract_strided_slice %307 {offsets = [0, 64], sizes = [8, 32], strides = [1, 1]} : vector<8x128xf32> to vector<8x32xf32>
    %cst_122 = arith.constant 2.000000e+00 : f32
    %311 = vector.broadcast %cst_122 : f32 to vector<8x32xf32>
    %312 = arith.mulf %311, %310 : vector<8x32xf32>
    %cst_123 = arith.constant 1.000000e+00 : f32
    %313 = vector.broadcast %cst_123 : f32 to vector<8x32xf32>
    %314 = arith.subf %312, %313 : vector<8x32xf32>
    %315 = vector.extract_strided_slice %307 {offsets = [0, 96], sizes = [8, 32], strides = [1, 1]} : vector<8x128xf32> to vector<8x32xf32>
    %316 = arith.mulf %309, %295 : vector<8x32xf32>
    %317 = arith.mulf %308, %314 : vector<8x32xf32>
    %318 = arith.addf %316, %317 : vector<8x32xf32>
    %319 = math.tanh %318 : vector<8x32xf32>
    %320 = arith.mulf %315, %319 : vector<8x32xf32>
    %c3_i32_124 = arith.constant 3 : i32
    %321 = arith.index_cast %c3_i32_124 : i32 to index
    %c0_125 = arith.constant 0 : index
    %c0_126 = arith.constant 0 : index
    %322 = vector.load %arg7[%321, %c0_125, %c0_126] : memref<8x8x128xf32, #tpu.memory_space<vmem>>, vector<1x8x128xf32>
    %323 = vector.shape_cast %322 : vector<1x8x128xf32> to vector<8x128xf32>
    %cst_127 = arith.constant dense<0.000000e+00> : vector<8x128xf32>
    %324 = tpu.matmul %320, %240, %cst_127 {dimension_numbers = #tpu.dot_dimension_numbers<[1], [0], [0], [1], [0, 0, 1, 1], [], []>} : vector<8x32xf32>, vector<32x128xf32>, vector<8x128xf32> -> vector<8x128xf32>
    %325 = arith.addf %323, %324 : vector<8x128xf32>
    %326 = arith.negf %325 : vector<8x128xf32>
    %327 = math.exp %326 : vector<8x128xf32>
    %cst_128 = arith.constant 1.000000e+00 : f32
    %328 = vector.broadcast %cst_128 : f32 to vector<8x128xf32>
    %329 = arith.addf %328, %327 : vector<8x128xf32>
    %330 = arith.divf %328, %329 : vector<8x128xf32>
    %331 = vector.extract_strided_slice %330 {offsets = [0, 0], sizes = [8, 32], strides = [1, 1]} : vector<8x128xf32> to vector<8x32xf32>
    %332 = vector.extract_strided_slice %330 {offsets = [0, 32], sizes = [8, 32], strides = [1, 1]} : vector<8x128xf32> to vector<8x32xf32>
    %333 = vector.extract_strided_slice %330 {offsets = [0, 64], sizes = [8, 32], strides = [1, 1]} : vector<8x128xf32> to vector<8x32xf32>
    %cst_129 = arith.constant 2.000000e+00 : f32
    %334 = vector.broadcast %cst_129 : f32 to vector<8x32xf32>
    %335 = arith.mulf %334, %333 : vector<8x32xf32>
    %cst_130 = arith.constant 1.000000e+00 : f32
    %336 = vector.broadcast %cst_130 : f32 to vector<8x32xf32>
    %337 = arith.subf %335, %336 : vector<8x32xf32>
    %338 = vector.extract_strided_slice %330 {offsets = [0, 96], sizes = [8, 32], strides = [1, 1]} : vector<8x128xf32> to vector<8x32xf32>
    %339 = arith.mulf %332, %318 : vector<8x32xf32>
    %340 = arith.mulf %331, %337 : vector<8x32xf32>
    %341 = arith.addf %339, %340 : vector<8x32xf32>
    %342 = math.tanh %341 : vector<8x32xf32>
    %343 = arith.mulf %338, %342 : vector<8x32xf32>
    %c4_i32_131 = arith.constant 4 : i32
    %344 = arith.index_cast %c4_i32_131 : i32 to index
    %c0_132 = arith.constant 0 : index
    %c0_133 = arith.constant 0 : index
    %345 = vector.load %arg7[%344, %c0_132, %c0_133] : memref<8x8x128xf32, #tpu.memory_space<vmem>>, vector<1x8x128xf32>
    %346 = vector.shape_cast %345 : vector<1x8x128xf32> to vector<8x128xf32>
    %cst_134 = arith.constant dense<0.000000e+00> : vector<8x128xf32>
    %347 = tpu.matmul %343, %240, %cst_134 {dimension_numbers = #tpu.dot_dimension_numbers<[1], [0], [0], [1], [0, 0, 1, 1], [], []>} : vector<8x32xf32>, vector<32x128xf32>, vector<8x128xf32> -> vector<8x128xf32>
    %348 = arith.addf %346, %347 : vector<8x128xf32>
    %349 = arith.negf %348 : vector<8x128xf32>
    %350 = math.exp %349 : vector<8x128xf32>
    %cst_135 = arith.constant 1.000000e+00 : f32
    %351 = vector.broadcast %cst_135 : f32 to vector<8x128xf32>
    %352 = arith.addf %351, %350 : vector<8x128xf32>
    %353 = arith.divf %351, %352 : vector<8x128xf32>
    %354 = vector.extract_strided_slice %353 {offsets = [0, 0], sizes = [8, 32], strides = [1, 1]} : vector<8x128xf32> to vector<8x32xf32>
    %355 = vector.extract_strided_slice %353 {offsets = [0, 32], sizes = [8, 32], strides = [1, 1]} : vector<8x128xf32> to vector<8x32xf32>
    %356 = vector.extract_strided_slice %353 {offsets = [0, 64], sizes = [8, 32], strides = [1, 1]} : vector<8x128xf32> to vector<8x32xf32>
    %cst_136 = arith.constant 2.000000e+00 : f32
    %357 = vector.broadcast %cst_136 : f32 to vector<8x32xf32>
    %358 = arith.mulf %357, %356 : vector<8x32xf32>
    %cst_137 = arith.constant 1.000000e+00 : f32
    %359 = vector.broadcast %cst_137 : f32 to vector<8x32xf32>
    %360 = arith.subf %358, %359 : vector<8x32xf32>
    %361 = vector.extract_strided_slice %353 {offsets = [0, 96], sizes = [8, 32], strides = [1, 1]} : vector<8x128xf32> to vector<8x32xf32>
    %362 = arith.mulf %355, %341 : vector<8x32xf32>
    %363 = arith.mulf %354, %360 : vector<8x32xf32>
    %364 = arith.addf %362, %363 : vector<8x32xf32>
    %365 = math.tanh %364 : vector<8x32xf32>
    %366 = arith.mulf %361, %365 : vector<8x32xf32>
    %c5_i32_138 = arith.constant 5 : i32
    %367 = arith.index_cast %c5_i32_138 : i32 to index
    %c0_139 = arith.constant 0 : index
    %c0_140 = arith.constant 0 : index
    %368 = vector.load %arg7[%367, %c0_139, %c0_140] : memref<8x8x128xf32, #tpu.memory_space<vmem>>, vector<1x8x128xf32>
    %369 = vector.shape_cast %368 : vector<1x8x128xf32> to vector<8x128xf32>
    %cst_141 = arith.constant dense<0.000000e+00> : vector<8x128xf32>
    %370 = tpu.matmul %366, %240, %cst_141 {dimension_numbers = #tpu.dot_dimension_numbers<[1], [0], [0], [1], [0, 0, 1, 1], [], []>} : vector<8x32xf32>, vector<32x128xf32>, vector<8x128xf32> -> vector<8x128xf32>
    %371 = arith.addf %369, %370 : vector<8x128xf32>
    %372 = arith.negf %371 : vector<8x128xf32>
    %373 = math.exp %372 : vector<8x128xf32>
    %cst_142 = arith.constant 1.000000e+00 : f32
    %374 = vector.broadcast %cst_142 : f32 to vector<8x128xf32>
    %375 = arith.addf %374, %373 : vector<8x128xf32>
    %376 = arith.divf %374, %375 : vector<8x128xf32>
    %377 = vector.extract_strided_slice %376 {offsets = [0, 0], sizes = [8, 32], strides = [1, 1]} : vector<8x128xf32> to vector<8x32xf32>
    %378 = vector.extract_strided_slice %376 {offsets = [0, 32], sizes = [8, 32], strides = [1, 1]} : vector<8x128xf32> to vector<8x32xf32>
    %379 = vector.extract_strided_slice %376 {offsets = [0, 64], sizes = [8, 32], strides = [1, 1]} : vector<8x128xf32> to vector<8x32xf32>
    %cst_143 = arith.constant 2.000000e+00 : f32
    %380 = vector.broadcast %cst_143 : f32 to vector<8x32xf32>
    %381 = arith.mulf %380, %379 : vector<8x32xf32>
    %cst_144 = arith.constant 1.000000e+00 : f32
    %382 = vector.broadcast %cst_144 : f32 to vector<8x32xf32>
    %383 = arith.subf %381, %382 : vector<8x32xf32>
    %384 = vector.extract_strided_slice %376 {offsets = [0, 96], sizes = [8, 32], strides = [1, 1]} : vector<8x128xf32> to vector<8x32xf32>
    %385 = arith.mulf %378, %364 : vector<8x32xf32>
    %386 = arith.mulf %377, %383 : vector<8x32xf32>
    %387 = arith.addf %385, %386 : vector<8x32xf32>
    %388 = math.tanh %387 : vector<8x32xf32>
    %389 = arith.mulf %384, %388 : vector<8x32xf32>
    %c6_i32_145 = arith.constant 6 : i32
    %390 = arith.index_cast %c6_i32_145 : i32 to index
    %c0_146 = arith.constant 0 : index
    %c0_147 = arith.constant 0 : index
    %391 = vector.load %arg7[%390, %c0_146, %c0_147] : memref<8x8x128xf32, #tpu.memory_space<vmem>>, vector<1x8x128xf32>
    %392 = vector.shape_cast %391 : vector<1x8x128xf32> to vector<8x128xf32>
    %cst_148 = arith.constant dense<0.000000e+00> : vector<8x128xf32>
    %393 = tpu.matmul %389, %240, %cst_148 {dimension_numbers = #tpu.dot_dimension_numbers<[1], [0], [0], [1], [0, 0, 1, 1], [], []>} : vector<8x32xf32>, vector<32x128xf32>, vector<8x128xf32> -> vector<8x128xf32>
    %394 = arith.addf %392, %393 : vector<8x128xf32>
    %395 = arith.negf %394 : vector<8x128xf32>
    %396 = math.exp %395 : vector<8x128xf32>
    %cst_149 = arith.constant 1.000000e+00 : f32
    %397 = vector.broadcast %cst_149 : f32 to vector<8x128xf32>
    %398 = arith.addf %397, %396 : vector<8x128xf32>
    %399 = arith.divf %397, %398 : vector<8x128xf32>
    %400 = vector.extract_strided_slice %399 {offsets = [0, 0], sizes = [8, 32], strides = [1, 1]} : vector<8x128xf32> to vector<8x32xf32>
    %401 = vector.extract_strided_slice %399 {offsets = [0, 32], sizes = [8, 32], strides = [1, 1]} : vector<8x128xf32> to vector<8x32xf32>
    %402 = vector.extract_strided_slice %399 {offsets = [0, 64], sizes = [8, 32], strides = [1, 1]} : vector<8x128xf32> to vector<8x32xf32>
    %cst_150 = arith.constant 2.000000e+00 : f32
    %403 = vector.broadcast %cst_150 : f32 to vector<8x32xf32>
    %404 = arith.mulf %403, %402 : vector<8x32xf32>
    %cst_151 = arith.constant 1.000000e+00 : f32
    %405 = vector.broadcast %cst_151 : f32 to vector<8x32xf32>
    %406 = arith.subf %404, %405 : vector<8x32xf32>
    %407 = vector.extract_strided_slice %399 {offsets = [0, 96], sizes = [8, 32], strides = [1, 1]} : vector<8x128xf32> to vector<8x32xf32>
    %408 = arith.mulf %401, %387 : vector<8x32xf32>
    %409 = arith.mulf %400, %406 : vector<8x32xf32>
    %410 = arith.addf %408, %409 : vector<8x32xf32>
    %411 = math.tanh %410 : vector<8x32xf32>
    %412 = arith.mulf %407, %411 : vector<8x32xf32>
    %c7_i32_152 = arith.constant 7 : i32
    %413 = arith.index_cast %c7_i32_152 : i32 to index
    %c0_153 = arith.constant 0 : index
    %c0_154 = arith.constant 0 : index
    %414 = vector.load %arg7[%413, %c0_153, %c0_154] : memref<8x8x128xf32, #tpu.memory_space<vmem>>, vector<1x8x128xf32>
    %415 = vector.shape_cast %414 : vector<1x8x128xf32> to vector<8x128xf32>
    %cst_155 = arith.constant dense<0.000000e+00> : vector<8x128xf32>
    %416 = tpu.matmul %412, %240, %cst_155 {dimension_numbers = #tpu.dot_dimension_numbers<[1], [0], [0], [1], [0, 0, 1, 1], [], []>} : vector<8x32xf32>, vector<32x128xf32>, vector<8x128xf32> -> vector<8x128xf32>
    %417 = arith.addf %415, %416 : vector<8x128xf32>
    %418 = arith.negf %417 : vector<8x128xf32>
    %419 = math.exp %418 : vector<8x128xf32>
    %cst_156 = arith.constant 1.000000e+00 : f32
    %420 = vector.broadcast %cst_156 : f32 to vector<8x128xf32>
    %421 = arith.addf %420, %419 : vector<8x128xf32>
    %422 = arith.divf %420, %421 : vector<8x128xf32>
    %423 = vector.extract_strided_slice %422 {offsets = [0, 0], sizes = [8, 32], strides = [1, 1]} : vector<8x128xf32> to vector<8x32xf32>
    %424 = vector.extract_strided_slice %422 {offsets = [0, 32], sizes = [8, 32], strides = [1, 1]} : vector<8x128xf32> to vector<8x32xf32>
    %425 = vector.extract_strided_slice %422 {offsets = [0, 64], sizes = [8, 32], strides = [1, 1]} : vector<8x128xf32> to vector<8x32xf32>
    %cst_157 = arith.constant 2.000000e+00 : f32
    %426 = vector.broadcast %cst_157 : f32 to vector<8x32xf32>
    %427 = arith.mulf %426, %425 : vector<8x32xf32>
    %cst_158 = arith.constant 1.000000e+00 : f32
    %428 = vector.broadcast %cst_158 : f32 to vector<8x32xf32>
    %429 = arith.subf %427, %428 : vector<8x32xf32>
    %430 = vector.extract_strided_slice %422 {offsets = [0, 96], sizes = [8, 32], strides = [1, 1]} : vector<8x128xf32> to vector<8x32xf32>
    %431 = arith.mulf %424, %410 : vector<8x32xf32>
    %432 = arith.mulf %423, %429 : vector<8x32xf32>
    %433 = arith.addf %431, %432 : vector<8x32xf32>
    %434 = math.tanh %433 : vector<8x32xf32>
    %435 = arith.mulf %430, %434 : vector<8x32xf32>
    %c8_i32_159 = arith.constant 8 : i32
    %c1_160 = arith.constant 1 : index
    %c0_161 = arith.constant 0 : index
    %c0_162 = arith.constant 0 : index
    %436 = vector.load %arg4[%c1_160, %c0_161, %c0_162] : memref<2x8x32xf32, #tpu.memory_space<vmem>>, vector<1x8x32xf32>
    %437 = vector.shape_cast %436 : vector<1x8x32xf32> to vector<8x32xf32>
    %438 = vector.shape_cast %435 : vector<8x32xf32> to vector<1x8x32xf32>
    tpu.vector_store %arg4[%c1_160, %c0_161, %c0_162], %438 {strides = array<i32>} : memref<2x8x32xf32, #tpu.memory_space<vmem>>, vector<1x8x32xf32>,
    %c1_163 = arith.constant 1 : index
    %c0_164 = arith.constant 0 : index
    %c0_165 = arith.constant 0 : index
    %439 = vector.load %arg5[%c1_163, %c0_164, %c0_165] : memref<2x8x32xf32, #tpu.memory_space<vmem>>, vector<1x8x32xf32>
    %440 = vector.shape_cast %439 : vector<1x8x32xf32> to vector<8x32xf32>
    %441 = vector.shape_cast %433 : vector<8x32xf32> to vector<1x8x32xf32>
    tpu.vector_store %arg5[%c1_163, %c0_164, %c0_165], %441 {strides = array<i32>} : memref<2x8x32xf32, #tpu.memory_space<vmem>>, vector<1x8x32xf32>,
    return
  }
}

</mosaic_0001>

<bundles_post_ra>
// kernel: encoder_forward.1
= control target key start
LH: loop header
LB: loop body
LE: loop exit
PB: predicated region body
PF: predicated region fallthrough
CT: control target
= control target key end

     0   :  { %v2523_v2 = vmov 0.0   ;;  %vm2524_vm0 = vmmov 0   ;;  %vm42_vm1 = vcmask 261120   ;;  %s2525_s15 = smov 64   ;;  %s2526_s16 = smov 32   ;;  %s2987_s1 = inlined_call_operand.vmem [shape: f32[2,32,128], index: 1, kind: input, shape index: {}]   ;;  %s2988_s2 = inlined_call_operand.vmem [shape: f32[2,32,128], index: 2, kind: input, shape index: {}]   ;;  %s2989_s0 = inlined_call_operand.vmem [shape: f32[8,8,32], index: 0, kind: input, shape index: {}]   ;;  %s2990_s3 = inlined_call_operand.vmem [shape: f32[2,1,128], index: 3, kind: input, shape index: {}]   ;;  %s2991_s4 = inlined_call_operand.vmem [shape: f32[2,8,32], index: 4, kind: output, shape index: {0}]   ;;  %s2992_s5 = inlined_call_operand.vmem [shape: f32[2,8,32], index: 5, kind: output, shape index: {1}]  }
   0x1   :  { %v22_v0 = vld [vmem:[%s2987_s1 + $0x18] sm:$0xff]  ;;  %v21_v1 = vld [vmem:[%s2987_s1 + $0x10] sm:$0xff]  ;;  %2226 = vmatprep.subr.mxu1 %v2523_v2  ;;  %2234 = vmatprep.mubr.msk.f32.mxu1 %vm2524_vm0, %v2523_v2  ;;  %v20_v5 = vld [vmem:[%s2987_s1 + $0x8] sm:$0xff]  ;;  %s2527_s22 = smov 96  }
   0x2   :  { %v2568_v3 = vld [vmem:[%s2988_s2 + $0x18] sm:$0xff]  ;;  %2206 = vmatprep.subr.mxu0 %v22_v0  ;;  %v2576_v4 = vld [vmem:[%s2988_s2 + $0x10] sm:$0xff]  ;;  %v28_v6 = vld [vmem:[%s2989_s0] sm:$0xff] }
   0x3   :  { %2227 = vmatpush3.msra.mxu1 %v2568_v3  ;;  %2207 = vmatpush3.msra.mxu0 %v22_v0  ;;  %v2589_v7 = vld [vmem:[%s2988_s2 + $0x8] sm:$0xff]  ;;  %v19_v8 = vld [vmem:[%s2987_s1] sm:$0xff]  ;;  %v30_v48 = vld [vmem:[%s2989_s0 + $0x10] sm:$0xff] }
   0x4   :  { %2228 = vmatprep.subr.mxu1 %v2523_v2  ;;  %2208 = vmatprep.subr.mxu0 %v21_v1  ;;  %v2599_v9 = vld [vmem:[%s2988_s2] sm:$0xff]  ;;  %v29_v10 = vld [vmem:[%s2989_s0 + $0x8] sm:$0xff]  ;;  %v31_v49 = vld [vmem:[%s2989_s0 + $0x18] sm:$0xff] }
   0x5   :  { %2229 = vmatpush3.msra.mxu1 %v2576_v4  ;;  %2209 = vmatpush3.msra.mxu0 %v21_v1  ;;  %v2632_v13 = vld [vmem:[%s2990_s3] ss:$0 sm:$0xff]  ;;  %v33_v51 = vld [vmem:[%s2989_s0 + $0x28] sm:$0xff]  ;;  %v34_v52 = vld [vmem:[%s2989_s0 + $0x30] sm:$0xff] }
   0x6   :  { %2230 = vmatprep.subr.mxu1 %v2523_v2  ;;  %2210 = vmatprep.subr.mxu0 %v20_v5  ;;  %v32_v50 = vld [vmem:[%s2989_s0 + $0x20] sm:$0xff]  ;;  %v35_v53 = vld [vmem:[%s2989_s0 + $0x38] sm:$0xff] }
   0x7   :  { %2214 = vmatprep.mubr.msk.f32.mxu0 %vm42_vm1, %v28_v6  ;;  %2211 = vmatpush3.msra.mxu0 %v20_v5 }
   0x8   :  { %2231 = vmatpush3.msra.mxu1 %v2589_v7  ;;  %2212 = vmatprep.subr.mxu0 %v19_v8 }
   0x9   :  { %2232 = vmatprep.subr.mxu1 %v2523_v2  ;;  %2213 = vmatpush3.msra.mxu0 %v19_v8 }
   0xa   :  { %2233 = vmatpush3.msra.mxu1 %v2599_v9  ;;  %2215 = vmatmul.mubr.msk.f32.vlgmr.msra.gmra.mxu0 %vm42_vm1, %v29_v10 }
   0xb   :  { %2235 = vmatmul.mubr.f32.vlgmr.msra.gmra.mxu1 %v2523_v2  ;;  %2237 = vmatprep.subr.mxu1 %v2523_v2 }
   0xc   :  { %2245 = vmatprep.mubr.msk.f32.mxu1 %vm2524_vm0, %v2523_v2  ;;  %2238 = vmatpush3.msra.mxu1 %v2568_v3 }
   0xd   :  { %2248 = vmatprep.subr.mxu0 %v2523_v2  ;;  %2239 = vmatprep.subr.mxu1 %v2523_v2 }
   0xe   :  { %2249 = vmatpush3.msra.mxu0 %v2568_v3  ;;  %2240 = vmatpush3.msra.mxu1 %v2576_v4 }
   0xf   :  { %2250 = vmatprep.subr.mxu0 %v2523_v2  ;;  %2241 = vmatprep.subr.mxu1 %v2523_v2 }
  0x10   :  { %2251 = vmatpush3.msra.mxu0 %v2576_v4  ;;  %2242 = vmatpush3.msra.mxu1 %v2589_v7 }
  0x11   :  { %2252 = vmatprep.subr.mxu0 %v2523_v2  ;;  %2243 = vmatprep.subr.mxu1 %v2523_v2 }
  0x12   :  { %2253 = vmatpush3.msra.mxu0 %v2589_v7  ;;  %2244 = vmatpush3.msra.mxu1 %v2599_v9 }
  0x13   :  { %2254 = vmatprep.subr.mxu0 %v2523_v2  ;;  %2259 = vmatprep.subr.mxu1 %v2523_v2 }
  0x14   :  { %2255 = vmatpush3.msra.mxu0 %v2599_v9  ;;  %2217 = vmatprep.mubr.msk.f32.mxu0 %vm42_vm1, %v30_v48 }
  0x15   :  { %2270 = vmatprep.subr.mxu0 %v2523_v2  ;;  %2218 = vmatmul.mubr.msk.f32.gmra.mxu0 %vm42_vm1, %v31_v49 }
  0x16   :  { %2220 = vmatprep.mubr.msk.f32.mxu0 %vm42_vm1, %v32_v50 }
  0x19   :  { %2221 = vmatmul.mubr.msk.f32.gmra.mxu0 %vm42_vm1, %v33_v51 }
  0x1a   :  { %2223 = vmatprep.mubr.msk.f32.mxu0 %vm42_vm1, %v34_v52 }
  0x1d   :  { %2224 = vmatmul.mubr.msk.f32.gmra.mxu0 %vm42_vm1, %v35_v53 }
  0x1e   :  { %2256 = vmatprep.mubr.msk.f32.mxu0 %vm2524_vm0, %v2523_v2 }
  0xca   :  { %v2216_v11 = vpop.f32.mrf.mxu0 }
  0xcb   :  { %v250_v12 = vpop.f32.mrf.mxu1  ;;  %v139_v33 = vadd.f32 %v2216_v11, %v2632_v13 }
  0xcc   :  { %v133_v14 = vpop.f32.mrf.mxu0 }
  0xcd   :  { %v2236_v15 = vpop.f32.mrf.mxu1  ;;  %v134_v16 = vadd.f32 %v2632_v13, %v133_v14 }
  0xcf   :  { %v254_v17 = vadd.f32 %v250_v12, %v134_v16 }
  0xd1   :  { %v2036_v18 = vmul.f32 -1.442695, %v254_v17 }
  0xd3   :  { %2427 = vpow2.f32 %v2036_v18 }
  0xd5   :  { %v2219_v58 = vpop.f32.mrf.mxu0 }
  0xd7   :  { %v143_v59 = vpop.f32.mrf.mxu0 }
  0xd8   :  { %v144_v0 = vadd.f32 %v2632_v13, %v143_v59 }
  0xd9   :  { %v2694_v60 = vpop.f32.mrf.mxu0 }
  0xdb   :  { %v2696_v61 = vpop.f32.mrf.mxu0 }
  0xdd   :  { %v2698_v62 = vpop.f32.mrf.mxu0 }
  0xdf   :  { %v2700_v63 = vpop.f32.mrf.mxu0 }
  0xe0   :  { %v2428_v19 = vpop.eup %2427 }
  0xe1   :  { %v258_v20 = vadd.f32 1.0, %v2428_v19 }
  0xe3   :  { %2429 = vrcp.f32 %v258_v20 }
  0xf0   :  { %v2430_v21 = vpop.eup %2429 }
  0xf1   :  { %v261_v22 = vmul.f32 2.0, %v2430_v21  ;;  %v263_v26 = vmul.f32 0.0, %v2430_v21 }
  0xf3   :  { %v2037_v23 = vadd.f32 -1.0, %v261_v22 }
  0xf5   :  { %265 = vrot.lane.b32.xlu0 %v2037_v23, %s2525_s15 }
 0x167   :  { %v266_v24 = vpop.permute.xlu0 %265 }
 0x168   :  { %v268_v25 = vmul.f32 %v2430_v21, %v266_v24 }
 0x16a   :  { %270 = vrot.lane.b32.xlu0 %v268_v25, %s2526_s16  ;;  %v149_v25 = vadd.f32 %v2219_v58, %v2632_v13 }
 0x1dc   :  { %v271_v27 = vpop.permute.xlu0 %270 }
 0x1dd   :  { %v273_v28 = vadd.f32 %v271_v27, %v263_v26 }
 0x1df   :  { %2431 = vtanh.f32 %v273_v28 }
 0x1ec   :  { %v2432_v29 = vpop.eup %2431 }
 0x1ed   :  { %276 = vrot.lane.b32.xlu1 %v2432_v29, %s2525_s15 }
 0x25f   :  { %v277_v30 = vpop.permute.xlu1 %276 }
 0x260   :  { %v279_v31 = vmul.f32 %v2430_v21, %v277_v30 }
 0x262   :  { %281 = vrot.lane.b32.xlu1 %v279_v31, %s2526_s16 }
 0x2d4   :  { %v282_v32 = vpop.permute.xlu1 %281 }
 0x2d5   :  { %284 = vst.msk [vmem:[#allocation2] sm:$0xff] %vm42_vm1, %v282_v32  ;;  %2246 = vmatmul.mubr.msk.f32.vlgmr.msra.gmra.mxu1 %vm42_vm1, %v282_v32 }
 0x2d6   :  { %2260 = vmatpush3.msra.mxu1 %v2568_v3  ;;  %2267 = vmatprep.mubr.msk.f32.mxu1 %vm2524_vm0, %v2523_v2 }
 0x2d7   :  { %2261 = vmatprep.subr.mxu1 %v2523_v2 }
 0x2d8   :  { %2262 = vmatpush3.msra.mxu1 %v2576_v4 }
 0x2d9   :  { %2263 = vmatprep.subr.mxu1 %v2523_v2 }
 0x2da   :  { %2264 = vmatpush3.msra.mxu1 %v2589_v7 }
 0x2db   :  { %2265 = vmatprep.subr.mxu1 %v2523_v2 }
 0x2dc   :  { %2266 = vmatpush3.msra.mxu1 %v2599_v9 }
 0x2dd   :  { %2281 = vmatprep.subr.mxu1 %v2523_v2 }
 0x395   :  { %v355_v34 = vpop.f32.mrf.mxu1 }
 0x396   :  { %v359_v35 = vadd.f32 %v355_v34, %v139_v33 }
 0x397   :  { %v2247_v36 = vpop.f32.mrf.mxu1 }
 0x398   :  { %v2039_v37 = vmul.f32 -1.442695, %v359_v35 }
 0x39a   :  { %2433 = vpow2.f32 %v2039_v37 }
 0x3a7   :  { %v2434_v38 = vpop.eup %2433 }
 0x3a8   :  { %v363_v39 = vadd.f32 1.0, %v2434_v38 }
 0x3aa   :  { %2435 = vrcp.f32 %v363_v39 }
 0x3b7   :  { %v2436_v40 = vpop.eup %2435 }
 0x3b8   :  { %v366_v41 = vmul.f32 2.0, %v2436_v40  ;;  %v368_v45 = vmul.f32 %v2436_v40, %v273_v28 }
 0x3ba   :  { %v2040_v42 = vadd.f32 -1.0, %v366_v41 }
 0x3bc   :  { %370 = vrot.lane.b32.xlu0 %v2040_v42, %s2525_s15 }
 0x42e   :  { %v371_v43 = vpop.permute.xlu0 %370 }
 0x42f   :  { %v373_v44 = vmul.f32 %v2436_v40, %v371_v43 }
 0x431   :  { %375 = vrot.lane.b32.xlu1 %v373_v44, %s2526_s16  ;;  %v154_v44 = vadd.f32 %v2632_v13, %v2696_v61 }
 0x4a3   :  { %v376_v46 = vpop.permute.xlu1 %375 }
 0x4a4   :  { %v378_v47 = vadd.f32 %v376_v46, %v368_v45 }
 0x4a6   :  { %2437 = vtanh.f32 %v378_v47 }
 0x4b3   :  { %v2438_v54 = vpop.eup %2437 }
 0x4b4   :  { %381 = vrot.lane.b32.xlu0 %v2438_v54, %s2525_s15 }
 0x526   :  { %v382_v55 = vpop.permute.xlu0 %381 }
 0x527   :  { %v384_v56 = vmul.f32 %v2436_v40, %v382_v55 }
 0x529   :  { %386 = vrot.lane.b32.xlu1 %v384_v56, %s2526_s16 }
 0x59b   :  { %v387_v57 = vpop.permute.xlu1 %386 }
 0x59c   :  { %390 = vst.msk [vmem:[#allocation2 + $0x8] sm:$0xff] %vm42_vm1, %v387_v57  ;;  %2257 = vmatmul.mubr.msk.f32.vlgmr.msra.gmra.mxu0 %vm42_vm1, %v387_v57 }
 0x59d   :  { %2271 = vmatpush3.msra.mxu0 %v2568_v3  ;;  %2278 = vmatprep.mubr.msk.f32.mxu0 %vm2524_vm0, %v2523_v2 }
 0x59e   :  { %2272 = vmatprep.subr.mxu0 %v2523_v2 }
 0x59f   :  { %2273 = vmatpush3.msra.mxu0 %v2576_v4 }
 0x5a0   :  { %2274 = vmatprep.subr.mxu0 %v2523_v2 }
 0x5a1   :  { %2275 = vmatpush3.msra.mxu0 %v2589_v7 }
 0x5a2   :  { %2276 = vmatprep.subr.mxu0 %v2523_v2 }
 0x5a3   :  { %2277 = vmatpush3.msra.mxu0 %v2599_v9 }
 0x5a4   :  { %2292 = vmatprep.subr.mxu0 %v2523_v2 }
 0x65c   :  { %v461_v1 = vpop.f32.mrf.mxu0 }
 0x65d   :  { %v465_v5 = vadd.f32 %v461_v1, %v144_v0 }
 0x65e   :  { %v2258_v6 = vpop.f32.mrf.mxu0 }
 0x65f   :  { %v2042_v8 = vmul.f32 -1.442695, %v465_v5 }
 0x661   :  { %2439 = vpow2.f32 %v2042_v8 }
 0x66e   :  { %v2440_v10 = vpop.eup %2439 }
 0x66f   :  { %v469_v11 = vadd.f32 1.0, %v2440_v10 }
 0x671   :  { %2441 = vrcp.f32 %v469_v11 }
 0x67e   :  { %v2442_v12 = vpop.eup %2441 }
 0x67f   :  { %v472_v14 = vmul.f32 2.0, %v2442_v12  ;;  %v474_v18 = vmul.f32 %v2442_v12, %v378_v47 }
 0x681   :  { %v2043_v15 = vadd.f32 -1.0, %v472_v14 }
 0x683   :  { %476 = vrot.lane.b32.xlu0 %v2043_v15, %s2525_s15 }
 0x6f5   :  { %v477_v16 = vpop.permute.xlu0 %476 }
 0x6f6   :  { %v479_v17 = vmul.f32 %v2442_v12, %v477_v16 }
 0x6f8   :  { %481 = vrot.lane.b32.xlu1 %v479_v17, %s2526_s16 }
 0x76a   :  { %v482_v19 = vpop.permute.xlu1 %481 }
 0x76b   :  { %v484_v20 = vadd.f32 %v482_v19, %v474_v18  ;;  %v2062_v18 = vld [vmem:[%s2987_s1 + $0x38] sm:$0xff] }
 0x76d   :  { %2443 = vtanh.f32 %v484_v20 }
 0x77a   :  { %v2444_v21 = vpop.eup %2443 }
 0x77b   :  { %487 = vrot.lane.b32.xlu0 %v2444_v21, %s2525_s15 }
 0x7ed   :  { %v488_v22 = vpop.permute.xlu0 %487 }
 0x7ee   :  { %v490_v23 = vmul.f32 %v2442_v12, %v488_v22 }
 0x7f0   :  { %492 = vrot.lane.b32.xlu1 %v490_v23, %s2526_s16  ;;  %v2061_v23 = vld [vmem:[%s2987_s1 + $0x30] sm:$0xff] }
 0x862   :  { %v493_v24 = vpop.permute.xlu1 %492 }
 0x863   :  { %496 = vst.msk [vmem:[#allocation2 + $0x10] sm:$0xff] %vm42_vm1, %v493_v24  ;;  %2268 = vmatmul.mubr.msk.f32.vlgmr.msra.gmra.mxu1 %vm42_vm1, %v493_v24  ;;  %v1045_v24 = vld [vmem:[#allocation2] sm:$0xff] }
 0x864   :  { %2282 = vmatpush3.msra.mxu1 %v2568_v3  ;;  %2289 = vmatprep.mubr.msk.f32.mxu1 %vm2524_vm0, %v2523_v2 }
 0x865   :  { %2283 = vmatprep.subr.mxu1 %v2523_v2 }
 0x866   :  { %2284 = vmatpush3.msra.mxu1 %v2576_v4 }
 0x867   :  { %2285 = vmatprep.subr.mxu1 %v2523_v2 }
 0x868   :  { %2286 = vmatpush3.msra.mxu1 %v2589_v7 }
 0x869   :  { %2287 = vmatprep.subr.mxu1 %v2523_v2 }
 0x86a   :  { %2288 = vmatpush3.msra.mxu1 %v2599_v9 }
 0x86b   :  { %2303 = vmatprep.subr.mxu1 %v2523_v2 }
 0x923   :  { %v567_v26 = vpop.f32.mrf.mxu1 }
 0x924   :  { %v571_v27 = vadd.f32 %v567_v26, %v149_v25  ;;  %v2060_v25 = vld [vmem:[%s2987_s1 + $0x28] sm:$0xff]  ;;  %v2059_v26 = vld [vmem:[%s2987_s1 + $0x20] sm:$0xff] }
 0x925   :  { %v2269_v28 = vpop.f32.mrf.mxu1 }
 0x926   :  { %v2045_v29 = vmul.f32 -1.442695, %v571_v27  ;;  %v1046_v27 = vld [vmem:[#allocation2 + $0x8] sm:$0xff]  ;;  %v1047_v28 = vld [vmem:[#allocation2 + $0x10] sm:$0xff] }
 0x928   :  { %2445 = vpow2.f32 %v2045_v29 }
 0x935   :  { %v2446_v30 = vpop.eup %2445 }
 0x936   :  { %v575_v31 = vadd.f32 1.0, %v2446_v30 }
 0x938   :  { %2447 = vrcp.f32 %v575_v31 }
 0x945   :  { %v2448_v32 = vpop.eup %2447 }
 0x946   :  { %v578_v33 = vmul.f32 2.0, %v2448_v32  ;;  %v580_v37 = vmul.f32 %v2448_v32, %v484_v20 }
 0x948   :  { %v2046_v34 = vadd.f32 -1.0, %v578_v33 }
 0x94a   :  { %582 = vrot.lane.b32.xlu0 %v2046_v34, %s2525_s15 }
 0x9bc   :  { %v583_v35 = vpop.permute.xlu0 %582 }
 0x9bd   :  { %v585_v36 = vmul.f32 %v2448_v32, %v583_v35 }
 0x9bf   :  { %587 = vrot.lane.b32.xlu1 %v585_v36, %s2526_s16 }
 0xa31   :  { %v588_v38 = vpop.permute.xlu1 %587 }
 0xa32   :  { %v590_v39 = vadd.f32 %v588_v38, %v580_v37 }
 0xa34   :  { %2449 = vtanh.f32 %v590_v39 }
 0xa41   :  { %v2450_v40 = vpop.eup %2449 }
 0xa42   :  { %593 = vrot.lane.b32.xlu0 %v2450_v40, %s2525_s15 }
 0xab4   :  { %v594_v41 = vpop.permute.xlu0 %593 }
 0xab5   :  { %v596_v42 = vmul.f32 %v2448_v32, %v594_v41  ;;  %v164_v32 = vadd.f32 %v2632_v13, %v2700_v63 }
 0xab7   :  { %598 = vrot.lane.b32.xlu1 %v596_v42, %s2526_s16 }
 0xb29   :  { %v599_v43 = vpop.permute.xlu1 %598 }
 0xb2a   :  { %602 = vst.msk [vmem:[#allocation2 + $0x18] sm:$0xff] %vm42_vm1, %v599_v43  ;;  %2279 = vmatmul.mubr.msk.f32.vlgmr.msra.gmra.mxu0 %vm42_vm1, %v599_v43 }
 0xb2b   :  { %2293 = vmatpush3.msra.mxu0 %v2568_v3  ;;  %2300 = vmatprep.mubr.msk.f32.mxu0 %vm2524_vm0, %v2523_v2 }
 0xb2c   :  { %2294 = vmatprep.subr.mxu0 %v2523_v2 }
 0xb2d   :  { %2295 = vmatpush3.msra.mxu0 %v2576_v4 }
 0xb2e   :  { %2296 = vmatprep.subr.mxu0 %v2523_v2 }
 0xb2f   :  { %2297 = vmatpush3.msra.mxu0 %v2589_v7 }
 0xb30   :  { %2298 = vmatprep.subr.mxu0 %v2523_v2 }
 0xb31   :  { %2299 = vmatpush3.msra.mxu0 %v2599_v9  ;;  %v1048_v29 = vld [vmem:[#allocation2 + $0x18] sm:$0xff] }
 0xb32   :  { %2314 = vmatprep.subr.mxu0 %v2062_v18 }
 0xbea   :  { %v673_v45 = vpop.f32.mrf.mxu0 }
 0xbeb   :  { %v677_v46 = vadd.f32 %v673_v45, %v154_v44 }
 0xbec   :  { %v2280_v47 = vpop.f32.mrf.mxu0 }
 0xbed   :  { %v2048_v48 = vmul.f32 -1.442695, %v677_v46  ;;  %v2791_v47 = vld [vmem:[%s2988_s2 + $0x38] sm:$0xff] }
 0xbef   :  { %2451 = vpow2.f32 %v2048_v48  ;;  %v2797_v48 = vld [vmem:[%s2988_s2 + $0x30] sm:$0xff] }
 0xbfc   :  { %v2452_v49 = vpop.eup %2451 }
 0xbfd   :  { %v681_v50 = vadd.f32 1.0, %v2452_v49  ;;  %v2804_v49 = vld [vmem:[%s2988_s2 + $0x28] sm:$0xff] }
 0xbff   :  { %2453 = vrcp.f32 %v681_v50  ;;  %v2811_v50 = vld [vmem:[%s2988_s2 + $0x20] sm:$0xff] }
 0xc0c   :  { %v2454_v51 = vpop.eup %2453 }
 0xc0d   :  { %v684_v52 = vmul.f32 2.0, %v2454_v51  ;;  %v686_v56 = vmul.f32 %v2454_v51, %v590_v39 }
 0xc0f   :  { %v2049_v53 = vadd.f32 -1.0, %v684_v52 }
 0xc11   :  { %688 = vrot.lane.b32.xlu0 %v2049_v53, %s2525_s15 }
 0xc83   :  { %v689_v54 = vpop.permute.xlu0 %688 }
 0xc84   :  { %v691_v55 = vmul.f32 %v2454_v51, %v689_v54 }
 0xc86   :  { %693 = vrot.lane.b32.xlu1 %v691_v55, %s2526_s16  ;;  %v169_v55 = vadd.f32 %v2698_v62, %v2632_v13 }
 0xcf8   :  { %v694_v57 = vpop.permute.xlu1 %693 }
 0xcf9   :  { %v696_v58 = vadd.f32 %v694_v57, %v686_v56 }
 0xcfb   :  { %2455 = vtanh.f32 %v696_v58 }
 0xd08   :  { %v2456_v59 = vpop.eup %2455 }
 0xd09   :  { %699 = vrot.lane.b32.xlu0 %v2456_v59, %s2525_s15 }
 0xd7b   :  { %v700_v61 = vpop.permute.xlu0 %699 }
 0xd7c   :  { %v702_v0 = vmul.f32 %v2454_v51, %v700_v61 }
 0xd7e   :  { %704 = vrot.lane.b32.xlu1 %v702_v0, %s2526_s16  ;;  %v2848_v0 = vld [vmem:[%s2990_s3 + $0x1] ss:$0 sm:$0xff] }
 0xdf0   :  { %v705_v1 = vpop.permute.xlu1 %704 }
 0xdf1   :  { %708 = vst.msk [vmem:[#allocation2 + $0x20] sm:$0xff] %vm42_vm1, %v705_v1  ;;  %2290 = vmatmul.mubr.msk.f32.vlgmr.msra.gmra.mxu1 %vm42_vm1, %v705_v1 }
 0xdf2   :  { %2304 = vmatpush3.msra.mxu1 %v2568_v3  ;;  %2311 = vmatprep.mubr.msk.f32.mxu1 %vm2524_vm0, %v2523_v2  ;;  %v159_v3 = vadd.f32 %v2694_v60, %v2632_v13 }
 0xdf3   :  { %2305 = vmatprep.subr.mxu1 %v2523_v2 }
 0xdf4   :  { %2306 = vmatpush3.msra.mxu1 %v2576_v4 }
 0xdf5   :  { %2307 = vmatprep.subr.mxu1 %v2523_v2 }
 0xdf6   :  { %2308 = vmatpush3.msra.mxu1 %v2589_v7 }
 0xdf7   :  { %2309 = vmatprep.subr.mxu1 %v2523_v2 }
 0xdf8   :  { %2310 = vmatpush3.msra.mxu1 %v2599_v9  ;;  %v1049_v30 = vld [vmem:[#allocation2 + $0x20] sm:$0xff] }
 0xdf9   :  { %2334 = vmatprep.subr.mxu1 %v2523_v2 }
 0xeb1   :  { %v779_v5 = vpop.f32.mrf.mxu1 }
 0xeb2   :  { %v783_v6 = vadd.f32 %v779_v5, %v159_v3 }
 0xeb3   :  { %v2291_v8 = vpop.f32.mrf.mxu1 }
 0xeb4   :  { %v2051_v10 = vmul.f32 -1.442695, %v783_v6 }
 0xeb6   :  { %2457 = vpow2.f32 %v2051_v10 }
 0xec3   :  { %v2458_v11 = vpop.eup %2457 }
 0xec4   :  { %v787_v4 = vadd.f32 1.0, %v2458_v11 }
 0xec6   :  { %2459 = vrcp.f32 %v787_v4 }
 0xed3   :  { %v2460_v12 = vpop.eup %2459 }
 0xed4   :  { %v790_v14 = vmul.f32 2.0, %v2460_v12  ;;  %v792_v16 = vmul.f32 %v2460_v12, %v696_v58 }
 0xed6   :  { %v2052_v7 = vadd.f32 -1.0, %v790_v14 }
 0xed8   :  { %794 = vrot.lane.b32.xlu0 %v2052_v7, %s2525_s15 }
 0xf4a   :  { %v795_v15 = vpop.permute.xlu0 %794 }
 0xf4b   :  { %v797_v9 = vmul.f32 %v2460_v12, %v795_v15 }
 0xf4d   :  { %799 = vrot.lane.b32.xlu1 %v797_v9, %s2526_s16 }
 0xfbf   :  { %v800_v17 = vpop.permute.xlu1 %799 }
 0xfc0   :  { %v802_v60 = vadd.f32 %v800_v17, %v792_v16 }
 0xfc2   :  { %2461 = vtanh.f32 %v802_v60 }
 0xfcf   :  { %v2462_v19 = vpop.eup %2461 }
 0xfd0   :  { %805 = vrot.lane.b32.xlu0 %v2462_v19, %s2525_s15 }
0x1042   :  { %v806_v20 = vpop.permute.xlu0 %805 }
0x1043   :  { %v808_v21 = vmul.f32 %v2460_v12, %v806_v20 }
0x1045   :  { %810 = vrot.lane.b32.xlu1 %v808_v21, %s2526_s16 }
0x10b7   :  { %v811_v22 = vpop.permute.xlu1 %810 }
0x10b8   :  { %814 = vst.msk [vmem:[#allocation2 + $0x28] sm:$0xff] %vm42_vm1, %v811_v22  ;;  %2301 = vmatmul.mubr.msk.f32.vlgmr.msra.gmra.mxu0 %vm42_vm1, %v811_v22 }
0x10b9   :  { %2315 = vmatpush3.msra.mxu0 %v2062_v18  ;;  %2322 = vmatprep.mubr.msk.f32.mxu0 %vm42_vm1, %v1045_v24 }
0x10ba   :  { %2316 = vmatprep.subr.mxu0 %v2061_v23 }
0x10bb   :  { %2317 = vmatpush3.msra.mxu0 %v2061_v23 }
0x10bc   :  { %2318 = vmatprep.subr.mxu0 %v2060_v25 }
0x10bd   :  { %2319 = vmatpush3.msra.mxu0 %v2060_v25 }
0x10be   :  { %2320 = vmatprep.subr.mxu0 %v2059_v26 }
0x10bf   :  { %2321 = vmatpush3.msra.mxu0 %v2059_v26  ;;  %v1050_v31 = vld [vmem:[#allocation2 + $0x28] sm:$0xff] }
0x10c0   :  { %2323 = vmatmul.mubr.msk.f32.vlgmr.msra.gmra.mxu0 %vm42_vm1, %v1046_v27  ;;  %2356 = vmatprep.subr.mxu0 %v2523_v2 }
0x10c1   :  { %2325 = vmatprep.mubr.msk.f32.mxu0 %vm42_vm1, %v1047_v28  ;;  %2357 = vmatpush3.msra.mxu0 %v2791_v47 }
0x10c2   :  { %2358 = vmatprep.subr.mxu0 %v2523_v2 }
0x10c3   :  { %2359 = vmatpush3.msra.mxu0 %v2797_v48 }
0x10c4   :  { %2326 = vmatmul.mubr.msk.f32.gmra.mxu0 %vm42_vm1, %v1048_v29  ;;  %2360 = vmatprep.subr.mxu0 %v2523_v2 }
0x10c5   :  { %2328 = vmatprep.mubr.msk.f32.mxu0 %vm42_vm1, %v1049_v30  ;;  %2361 = vmatpush3.msra.mxu0 %v2804_v49 }
0x10c6   :  { %2362 = vmatprep.subr.mxu0 %v2523_v2 }
0x10c7   :  { %2363 = vmatpush3.msra.mxu0 %v2811_v50 }
0x10c8   :  { %2329 = vmatmul.mubr.msk.f32.gmra.mxu0 %vm42_vm1, %v1050_v31  ;;  %2378 = vmatprep.subr.mxu0 %v2523_v2 }
0x1178   :  { %v885_v33 = vpop.f32.mrf.mxu0 }
0x1179   :  { %v889_v34 = vadd.f32 %v885_v33, %v164_v32 }
0x117a   :  { %v2302_v35 = vpop.f32.mrf.mxu0 }
0x117b   :  { %v2054_v36 = vmul.f32 -1.442695, %v889_v34 }
0x117d   :  { %2463 = vpow2.f32 %v2054_v36 }
0x1180   :  { %v2843_v56 = vpop.f32.mrf.mxu0 }
0x1181   :  { %v1155_v33 = vadd.f32 %v2843_v56, %v2848_v0 }
0x1182   :  { %v1149_v61 = vpop.f32.mrf.mxu0 }
0x1183   :  { %v1150_v1 = vadd.f32 %v2848_v0, %v1149_v61 }
0x118a   :  { %v2464_v37 = vpop.eup %2463 }
0x118b   :  { %v893_v38 = vadd.f32 1.0, %v2464_v37 }
0x118d   :  { %2465 = vrcp.f32 %v893_v38 }
0x119a   :  { %v2466_v39 = vpop.eup %2465 }
0x119b   :  { %v896_v40 = vmul.f32 2.0, %v2466_v39  ;;  %v898_v44 = vmul.f32 %v2466_v39, %v802_v60 }
0x119d   :  { %v2055_v41 = vadd.f32 -1.0, %v896_v40 }
0x119f   :  { %900 = vrot.lane.b32.xlu0 %v2055_v41, %s2525_s15 }
0x1211   :  { %v901_v42 = vpop.permute.xlu0 %900 }
0x1212   :  { %v903_v43 = vmul.f32 %v2466_v39, %v901_v42 }
0x1214   :  { %905 = vrot.lane.b32.xlu1 %v903_v43, %s2526_s16 }
0x1286   :  { %v906_v45 = vpop.permute.xlu1 %905 }
0x1287   :  { %v2784_v63 = vadd.f32 %v906_v45, %v898_v44 }
0x1289   :  { %2467 = vtanh.f32 %v2784_v63 }
0x1296   :  { %v2468_v46 = vpop.eup %2467 }
0x1297   :  { %911 = vrot.lane.b32.xlu0 %v2468_v46, %s2525_s15 }
0x1309   :  { %v912_v51 = vpop.permute.xlu0 %911 }
0x130a   :  { %v914_v52 = vmul.f32 %v2466_v39, %v912_v51 }
0x130c   :  { %916 = vrot.lane.b32.xlu1 %v914_v52, %s2526_s16 }
0x137e   :  { %v917_v53 = vpop.permute.xlu1 %916 }
0x137f   :  { %920 = vst.msk [vmem:[#allocation2 + $0x30] sm:$0xff] %vm42_vm1, %v917_v53  ;;  %2312 = vmatmul.mubr.msk.f32.vlgmr.msra.gmra.mxu1 %vm42_vm1, %v917_v53 }
0x1380   :  { %2335 = vmatpush3.msra.mxu1 %v2791_v47  ;;  %2342 = vmatprep.mubr.msk.f32.mxu1 %vm2524_vm0, %v2523_v2 }
0x1381   :  { %2336 = vmatprep.subr.mxu1 %v2523_v2 }
0x1382   :  { %2337 = vmatpush3.msra.mxu1 %v2797_v48 }
0x1383   :  { %2338 = vmatprep.subr.mxu1 %v2523_v2 }
0x1384   :  { %2339 = vmatpush3.msra.mxu1 %v2804_v49 }
0x1385   :  { %2340 = vmatprep.subr.mxu1 %v2523_v2 }
0x1386   :  { %2341 = vmatpush3.msra.mxu1 %v2811_v50  ;;  %v1051_v54 = vld [vmem:[#allocation2 + $0x30] sm:$0xff] }
0x1387   :  { %2343 = vmatmul.mubr.f32.vlgmr.msra.gmra.mxu1 %v2523_v2  ;;  %2331 = vmatprep.mubr.msk.f32.mxu0 %vm42_vm1, %v1051_v54 }
0x1388   :  { %2345 = vmatprep.subr.mxu1 %v2523_v2  ;;  %2353 = vmatprep.mubr.msk.f32.mxu1 %vm2524_vm0, %v2523_v2 }
0x1389   :  { %2346 = vmatpush3.msra.mxu1 %v2791_v47 }
0x138a   :  { %2347 = vmatprep.subr.mxu1 %v2523_v2 }
0x138b   :  { %2348 = vmatpush3.msra.mxu1 %v2797_v48 }
0x138c   :  { %2349 = vmatprep.subr.mxu1 %v2523_v2 }
0x138d   :  { %2350 = vmatpush3.msra.mxu1 %v2804_v49 }
0x138e   :  { %2351 = vmatprep.subr.mxu1 %v2523_v2 }
0x138f   :  { %2352 = vmatpush3.msra.mxu1 %v2811_v50 }
0x1390   :  { %2367 = vmatprep.subr.mxu1 %v2523_v2 }
0x143f   :  { %v991_v57 = vpop.f32.mrf.mxu1 }
0x1440   :  { %v995_v58 = vadd.f32 %v991_v57, %v169_v55  ;;  %v2327_v57 = vpop.f32.mrf.mxu0 }
0x1441   :  { %v2313_v59 = vpop.f32.mrf.mxu1 }
0x1442   :  { %v2057_v7 = vmul.f32 -1.442695, %v995_v58  ;;  %v1159_v58 = vpop.f32.mrf.mxu0 }
0x1444   :  { %v2899_v59 = vpop.f32.mrf.mxu0 }
0x1446   :  { %v2901_v61 = vpop.f32.mrf.mxu0 }
0x1447   :  { %v1263_v3 = vpop.f32.mrf.mxu1 }
0x1448   :  { %v1267_v5 = vadd.f32 %v1263_v3, %v1150_v1 }
0x1449   :  { %v2344_v6 = vpop.f32.mrf.mxu1 }
0x144a   :  { %v2077_v8 = vmul.f32 -1.442695, %v1267_v5  ;;  %v1160_v5 = vadd.f32 %v2848_v0, %v1159_v58 }
0x144c   :  { %2469 = vpow2.f32 %v2077_v8 }
0x1459   :  { %v2470_v10 = vpop.eup %2469 }
0x145a   :  { %v1271_v13 = vadd.f32 1.0, %v2470_v10 }
0x145c   :  { %2471 = vrcp.f32 %v1271_v13 }
0x145d   :  { %2473 = vpow2.f32 %v2057_v7 }
0x1469   :  { %v2472_v62 = vpop.eup %2471 }
0x146a   :  { %v1274_v11 = vmul.f32 2.0, %v2472_v62  ;;  %v2474_v15 = vpop.eup %2473  ;;  %v1276_v16 = vmul.f32 0.0, %v2472_v62 }
0x146b   :  { %v999_v9 = vadd.f32 1.0, %v2474_v15 }
0x146c   :  { %v2078_v4 = vadd.f32 -1.0, %v1274_v11 }
0x146d   :  { %2475 = vrcp.f32 %v999_v9 }
0x146e   :  { %1278 = vrot.lane.b32.xlu0 %v2078_v4, %s2525_s15 }
0x147a   :  { %v2476_v18 = vpop.eup %2475 }
0x147b   :  { %v1002_v19 = vmul.f32 2.0, %v2476_v18  ;;  %v1004_v27 = vmul.f32 %v2476_v18, %v2784_v63 }
0x147d   :  { %v2058_v21 = vadd.f32 -1.0, %v1002_v19 }
0x14e0   :  { %v1279_v12 = vpop.permute.xlu0 %1278 }
0x14e1   :  { %v1281_v14 = vmul.f32 %v2472_v62, %v1279_v12 }
0x14e3   :  { %1283 = vrot.lane.b32.xlu1 %v1281_v14, %s2526_s16 }
0x1555   :  { %v1284_v17 = vpop.permute.xlu1 %1283 }
0x1556   :  { %v1286_v60 = vadd.f32 %v1284_v17, %v1276_v16 }
0x1558   :  { %2477 = vtanh.f32 %v1286_v60 }
0x1565   :  { %v2478_v20 = vpop.eup %2477 }
0x1566   :  { %1289 = vrot.lane.b32.xlu0 %v2478_v20, %s2525_s15 }
0x156a   :  { %1006 = vrot.lane.b32.xlu0 %v2058_v21, %s2525_s15  ;;  %v1165_v21 = vadd.f32 %v2327_v57, %v2848_v0 }
0x15d8   :  { %v1290_v22 = vpop.permute.xlu0 %1289 }
0x15d9   :  { %v1292_v23 = vmul.f32 %v2472_v62, %v1290_v22 }
0x15db   :  { %1295 = vrot.lane.b32.xlu1 %v1292_v23, %s2526_s16 }
0x15dc   :  { %v1007_v24 = vpop.permute.xlu0 %1006 }
0x15dd   :  { %v1009_v25 = vmul.f32 %v2476_v18, %v1007_v24 }
0x15df   :  { %1011 = vrot.lane.b32.xlu0 %v1009_v25, %s2526_s16 }
0x164d   :  { %v1296_v26 = vpop.permute.xlu1 %1295 }
0x164e   :  { %2354 = vmatmul.mubr.msk.f32.vlgmr.msra.gmra.mxu1 %vm42_vm1, %v1296_v26 }
0x164f   :  { %2368 = vmatpush3.msra.mxu1 %v2791_v47  ;;  %2375 = vmatprep.mubr.msk.f32.mxu1 %vm2524_vm0, %v2523_v2 }
0x1650   :  { %2369 = vmatprep.subr.mxu1 %v2523_v2 }
0x1651   :  { %v1012_v28 = vpop.permute.xlu0 %1011  ;;  %2370 = vmatpush3.msra.mxu1 %v2797_v48 }
0x1652   :  { %v2864_v29 = vadd.f32 %v1012_v28, %v1004_v27  ;;  %2371 = vmatprep.subr.mxu1 %v2523_v2 }
0x1653   :  { %2372 = vmatpush3.msra.mxu1 %v2804_v49 }
0x1654   :  { %2479 = vtanh.f32 %v2864_v29  ;;  %2373 = vmatprep.subr.mxu1 %v2523_v2 }
0x1655   :  { %2374 = vmatpush3.msra.mxu1 %v2811_v50 }
0x1656   :  { %2389 = vmatprep.subr.mxu1 %v2523_v2 }
0x1661   :  { %v2480_v30 = vpop.eup %2479 }
0x1662   :  { %1017 = vrot.lane.b32.xlu0 %v2480_v30, %s2525_s15 }
0x16d4   :  { %v1018_v31 = vpop.permute.xlu0 %1017 }
0x16d5   :  { %v1020_v32 = vmul.f32 %v2476_v18, %v1018_v31 }
0x16d7   :  { %1022 = vrot.lane.b32.xlu0 %v1020_v32, %s2526_s16 }
0x170e   :  { %v1365_v34 = vpop.f32.mrf.mxu1 }
0x170f   :  { %v1369_v35 = vadd.f32 %v1365_v34, %v1155_v33 }
0x1710   :  { %v2355_v36 = vpop.f32.mrf.mxu1 }
0x1711   :  { %v2080_v37 = vmul.f32 -1.442695, %v1369_v35 }
0x1713   :  { %2481 = vpow2.f32 %v2080_v37 }
0x1720   :  { %v2482_v38 = vpop.eup %2481 }
0x1721   :  { %v1373_v39 = vadd.f32 1.0, %v2482_v38 }
0x1723   :  { %2483 = vrcp.f32 %v1373_v39 }
0x1730   :  { %v2484_v40 = vpop.eup %2483 }
0x1731   :  { %v1376_v41 = vmul.f32 2.0, %v2484_v40  ;;  %v1378_v46 = vmul.f32 %v2484_v40, %v1286_v60 }
0x1733   :  { %v2081_v42 = vadd.f32 -1.0, %v1376_v41  ;;  %v1170_v41 = vadd.f32 %v2848_v0, %v2901_v61 }
0x1735   :  { %1380 = vrot.lane.b32.xlu1 %v2081_v42, %s2525_s15 }
0x1749   :  { %v1023_v43 = vpop.permute.xlu0 %1022 }
0x174a   :  { %1026 = vst.msk [vmem:[#allocation2 + $0x38] sm:$0xff] %vm42_vm1, %v1023_v43  ;;  %1027 = vst.msk [vmem:[%s2991_s4] sm:$0xff] %vm42_vm1, %v1023_v43 }
0x1751   :  { %v1052_v44 = vld [vmem:[#allocation2 + $0x38] sm:$0xff] }
0x1752   :  { %2332 = vmatmul.mubr.msk.f32.gmra.mxu0 %vm42_vm1, %v1052_v44 }
0x1753   :  { %2364 = vmatprep.mubr.msk.f32.mxu0 %vm2524_vm0, %v2523_v2 }
0x17a7   :  { %v1381_v45 = vpop.permute.xlu1 %1380 }
0x17a8   :  { %v1383_v63 = vmul.f32 %v2484_v40, %v1381_v45 }
0x17aa   :  { %1385 = vrot.lane.b32.xlu1 %v1383_v63, %s2526_s16 }
0x1812   :  { %v2903_v1 = vpop.f32.mrf.mxu0 }
0x1814   :  { %v2905_v3 = vpop.f32.mrf.mxu0 }
0x181c   :  { %v1386_v51 = vpop.permute.xlu1 %1385 }
0x181d   :  { %v1388_v52 = vadd.f32 %v1386_v51, %v1378_v46 }
0x181f   :  { %2485 = vtanh.f32 %v1388_v52 }
0x182c   :  { %v2486_v53 = vpop.eup %2485 }
0x182d   :  { %1391 = vrot.lane.b32.xlu1 %v2486_v53, %s2525_s15 }
0x189f   :  { %v1392_v54 = vpop.permute.xlu1 %1391 }
0x18a0   :  { %v1394_v55 = vmul.f32 %v2484_v40, %v1392_v54 }
0x18a2   :  { %1397 = vrot.lane.b32.xlu1 %v1394_v55, %s2526_s16 }
0x1914   :  { %v1398_v56 = vpop.permute.xlu1 %1397 }
0x1915   :  { %2365 = vmatmul.mubr.msk.f32.vlgmr.msra.gmra.mxu0 %vm42_vm1, %v1398_v56 }
0x1916   :  { %2379 = vmatpush3.msra.mxu0 %v2791_v47  ;;  %2386 = vmatprep.mubr.msk.f32.mxu0 %vm2524_vm0, %v2523_v2 }
0x1917   :  { %2380 = vmatprep.subr.mxu0 %v2523_v2 }
0x1918   :  { %2381 = vmatpush3.msra.mxu0 %v2797_v48 }
0x1919   :  { %2382 = vmatprep.subr.mxu0 %v2523_v2 }
0x191a   :  { %2383 = vmatpush3.msra.mxu0 %v2804_v49 }
0x191b   :  { %2384 = vmatprep.subr.mxu0 %v2523_v2 }
0x191c   :  { %2385 = vmatpush3.msra.mxu0 %v2811_v50 }
0x191d   :  { %2400 = vmatprep.subr.mxu0 %v2523_v2 }
0x19d5   :  { %v1467_v6 = vpop.f32.mrf.mxu0 }
0x19d6   :  { %v1471_v8 = vadd.f32 %v1467_v6, %v1160_v5 }
0x19d7   :  { %v2366_v10 = vpop.f32.mrf.mxu0 }
0x19d8   :  { %v2083_v13 = vmul.f32 -1.442695, %v1471_v8  ;;  %v1175_v10 = vadd.f32 %v2899_v59, %v2848_v0 }
0x19da   :  { %2487 = vpow2.f32 %v2083_v13 }
0x19e7   :  { %v2488_v62 = vpop.eup %2487 }
0x19e8   :  { %v1475_v11 = vadd.f32 1.0, %v2488_v62 }
0x19ea   :  { %2489 = vrcp.f32 %v1475_v11 }
0x19f7   :  { %v2490_v4 = vpop.eup %2489 }
0x19f8   :  { %v1478_v12 = vmul.f32 2.0, %v2490_v4  ;;  %v1480_v9 = vmul.f32 %v2490_v4, %v1388_v52 }
0x19fa   :  { %v2084_v14 = vadd.f32 -1.0, %v1478_v12 }
0x19fc   :  { %1482 = vrot.lane.b32.xlu0 %v2084_v14, %s2525_s15 }
0x1a6e   :  { %v1483_v7 = vpop.permute.xlu0 %1482 }
0x1a6f   :  { %v1485_v15 = vmul.f32 %v2490_v4, %v1483_v7 }
0x1a71   :  { %1487 = vrot.lane.b32.xlu1 %v1485_v15, %s2526_s16 }
0x1ae3   :  { %v1488_v16 = vpop.permute.xlu1 %1487 }
0x1ae4   :  { %v1490_v17 = vadd.f32 %v1488_v16, %v1480_v9 }
0x1ae6   :  { %2491 = vtanh.f32 %v1490_v17 }
0x1af3   :  { %v2492_v60 = vpop.eup %2491 }
0x1af4   :  { %1493 = vrot.lane.b32.xlu0 %v2492_v60, %s2525_s15 }
0x1b66   :  { %v1494_v18 = vpop.permute.xlu0 %1493 }
0x1b67   :  { %v1496_v19 = vmul.f32 %v2490_v4, %v1494_v18  ;;  %v1180_v18 = vadd.f32 %v2848_v0, %v2905_v3 }
0x1b69   :  { %1499 = vrot.lane.b32.xlu1 %v1496_v19, %s2526_s16 }
0x1bdb   :  { %v1500_v20 = vpop.permute.xlu1 %1499 }
0x1bdc   :  { %2376 = vmatmul.mubr.msk.f32.vlgmr.msra.gmra.mxu1 %vm42_vm1, %v1500_v20 }
0x1bdd   :  { %2390 = vmatpush3.msra.mxu1 %v2791_v47  ;;  %2397 = vmatprep.mubr.msk.f32.mxu1 %vm2524_vm0, %v2523_v2 }
0x1bde   :  { %2391 = vmatprep.subr.mxu1 %v2523_v2 }
0x1bdf   :  { %2392 = vmatpush3.msra.mxu1 %v2797_v48 }
0x1be0   :  { %2393 = vmatprep.subr.mxu1 %v2523_v2 }
0x1be1   :  { %2394 = vmatpush3.msra.mxu1 %v2804_v49 }
0x1be2   :  { %2395 = vmatprep.subr.mxu1 %v2523_v2 }
0x1be3   :  { %2396 = vmatpush3.msra.mxu1 %v2811_v50 }
0x1be4   :  { %2411 = vmatprep.subr.mxu1 %v2523_v2 }
0x1c9c   :  { %v1569_v22 = vpop.f32.mrf.mxu1 }
0x1c9d   :  { %v1573_v23 = vadd.f32 %v1569_v22, %v1165_v21 }
0x1c9e   :  { %v2377_v24 = vpop.f32.mrf.mxu1 }
0x1c9f   :  { %v2086_v25 = vmul.f32 -1.442695, %v1573_v23 }
0x1ca1   :  { %2493 = vpow2.f32 %v2086_v25 }
0x1cae   :  { %v2494_v26 = vpop.eup %2493 }
0x1caf   :  { %v1577_v27 = vadd.f32 1.0, %v2494_v26 }
0x1cb1   :  { %2495 = vrcp.f32 %v1577_v27 }
0x1cbe   :  { %v2496_v28 = vpop.eup %2495 }
0x1cbf   :  { %v1580_v30 = vmul.f32 2.0, %v2496_v28  ;;  %v1582_v34 = vmul.f32 %v2496_v28, %v1490_v17 }
0x1cc1   :  { %v2087_v31 = vadd.f32 -1.0, %v1580_v30 }
0x1cc3   :  { %1584 = vrot.lane.b32.xlu0 %v2087_v31, %s2525_s15 }
0x1d35   :  { %v1585_v32 = vpop.permute.xlu0 %1584 }
0x1d36   :  { %v1587_v33 = vmul.f32 %v2496_v28, %v1585_v32 }
0x1d38   :  { %1589 = vrot.lane.b32.xlu1 %v1587_v33, %s2526_s16 }
0x1daa   :  { %v1590_v35 = vpop.permute.xlu1 %1589 }
0x1dab   :  { %v1592_v36 = vadd.f32 %v1590_v35, %v1582_v34 }
0x1dad   :  { %2497 = vtanh.f32 %v1592_v36 }
0x1dba   :  { %v2498_v37 = vpop.eup %2497 }
0x1dbb   :  { %1595 = vrot.lane.b32.xlu0 %v2498_v37, %s2525_s15  ;;  %v1185_v37 = vadd.f32 %v2903_v1, %v2848_v0 }
0x1e2d   :  { %v1596_v38 = vpop.permute.xlu0 %1595 }
0x1e2e   :  { %v1598_v39 = vmul.f32 %v2496_v28, %v1596_v38 }
0x1e30   :  { %1601 = vrot.lane.b32.xlu1 %v1598_v39, %s2526_s16 }
0x1ea2   :  { %v1602_v40 = vpop.permute.xlu1 %1601 }
0x1ea3   :  { %2387 = vmatmul.mubr.msk.f32.vlgmr.msra.gmra.mxu0 %vm42_vm1, %v1602_v40 }
0x1ea4   :  { %2401 = vmatpush3.msra.mxu0 %v2791_v47  ;;  %2408 = vmatprep.mubr.msk.f32.mxu0 %vm2524_vm0, %v2523_v2 }
0x1ea5   :  { %2402 = vmatprep.subr.mxu0 %v2523_v2 }
0x1ea6   :  { %2403 = vmatpush3.msra.mxu0 %v2797_v48 }
0x1ea7   :  { %2404 = vmatprep.subr.mxu0 %v2523_v2 }
0x1ea8   :  { %2405 = vmatpush3.msra.mxu0 %v2804_v49 }
0x1ea9   :  { %2406 = vmatprep.subr.mxu0 %v2523_v2 }
0x1eaa   :  { %2407 = vmatpush3.msra.mxu0 %v2811_v50 }
0x1f63   :  { %v1671_v42 = vpop.f32.mrf.mxu0 }
0x1f64   :  { %v1675_v43 = vadd.f32 %v1671_v42, %v1170_v41 }
0x1f65   :  { %v2388_v44 = vpop.f32.mrf.mxu0 }
0x1f66   :  { %v2089_v45 = vmul.f32 -1.442695, %v1675_v43 }
0x1f68   :  { %2499 = vpow2.f32 %v2089_v45 }
0x1f75   :  { %v2500_v63 = vpop.eup %2499 }
0x1f76   :  { %v1679_v46 = vadd.f32 1.0, %v2500_v63 }
0x1f78   :  { %2501 = vrcp.f32 %v1679_v46 }
0x1f85   :  { %v2502_v51 = vpop.eup %2501 }
0x1f86   :  { %v1682_v52 = vmul.f32 2.0, %v2502_v51  ;;  %v1684_v56 = vmul.f32 %v2502_v51, %v1592_v36 }
0x1f88   :  { %v2090_v53 = vadd.f32 -1.0, %v1682_v52 }
0x1f8a   :  { %1686 = vrot.lane.b32.xlu0 %v2090_v53, %s2525_s15 }
0x1ffc   :  { %v1687_v54 = vpop.permute.xlu0 %1686 }
0x1ffd   :  { %v1689_v55 = vmul.f32 %v2502_v51, %v1687_v54 }
0x1fff   :  { %1691 = vrot.lane.b32.xlu1 %v1689_v55, %s2526_s16 }
0x2071   :  { %v1692_v57 = vpop.permute.xlu1 %1691 }
0x2072   :  { %v1694_v58 = vadd.f32 %v1692_v57, %v1684_v56 }
0x2074   :  { %2503 = vtanh.f32 %v1694_v58 }
0x2081   :  { %v2504_v61 = vpop.eup %2503 }
0x2082   :  { %1697 = vrot.lane.b32.xlu0 %v2504_v61, %s2525_s15 }
0x20f4   :  { %v1698_v5 = vpop.permute.xlu0 %1697 }
0x20f5   :  { %v1700_v6 = vmul.f32 %v2502_v51, %v1698_v5 }
0x20f7   :  { %1703 = vrot.lane.b32.xlu1 %v1700_v6, %s2526_s16 }
0x2169   :  { %v1704_v8 = vpop.permute.xlu1 %1703 }
0x216a   :  { %2398 = vmatmul.mubr.msk.f32.vlgmr.msra.gmra.mxu1 %vm42_vm1, %v1704_v8 }
0x216b   :  { %2412 = vmatpush3.msra.mxu1 %v2791_v47  ;;  %2419 = vmatprep.mubr.msk.f32.mxu1 %vm2524_vm0, %v2523_v2 }
0x216c   :  { %2413 = vmatprep.subr.mxu1 %v2523_v2 }
0x216d   :  { %2414 = vmatpush3.msra.mxu1 %v2797_v48 }
0x216e   :  { %2415 = vmatprep.subr.mxu1 %v2523_v2 }
0x216f   :  { %2416 = vmatpush3.msra.mxu1 %v2804_v49 }
0x2170   :  { %2417 = vmatprep.subr.mxu1 %v2523_v2 }
0x2171   :  { %2418 = vmatpush3.msra.mxu1 %v2811_v50 }
0x222a   :  { %v1773_v13 = vpop.f32.mrf.mxu1 }
0x222b   :  { %v1777_v47 = vadd.f32 %v1773_v13, %v1175_v10 }
0x222c   :  { %v2399_v62 = vpop.f32.mrf.mxu1 }
0x222d   :  { %v2092_v11 = vmul.f32 -1.442695, %v1777_v47 }
0x222f   :  { %2505 = vpow2.f32 %v2092_v11 }
0x223c   :  { %v2506_v4 = vpop.eup %2505 }
0x223d   :  { %v1781_v12 = vadd.f32 1.0, %v2506_v4 }
0x223f   :  { %2507 = vrcp.f32 %v1781_v12 }
0x224c   :  { %v2508_v48 = vpop.eup %2507 }
0x224d   :  { %v1784_v14 = vmul.f32 2.0, %v2508_v48  ;;  %v1786_v50 = vmul.f32 %v2508_v48, %v1694_v58 }
0x224f   :  { %v2093_v7 = vadd.f32 -1.0, %v1784_v14 }
0x2251   :  { %1788 = vrot.lane.b32.xlu0 %v2093_v7, %s2525_s15 }
0x22c3   :  { %v1789_v49 = vpop.permute.xlu0 %1788 }
0x22c4   :  { %v1791_v2 = vmul.f32 %v2508_v48, %v1789_v49 }
0x22c6   :  { %1793 = vrot.lane.b32.xlu1 %v1791_v2, %s2526_s16 }
0x2338   :  { %v1794_v15 = vpop.permute.xlu1 %1793 }
0x2339   :  { %v1796_v59 = vadd.f32 %v1794_v15, %v1786_v50 }
0x233b   :  { %2509 = vtanh.f32 %v1796_v59 }
0x2348   :  { %v2510_v9 = vpop.eup %2509 }
0x2349   :  { %1799 = vrot.lane.b32.xlu0 %v2510_v9, %s2525_s15 }
0x23bb   :  { %v1800_v16 = vpop.permute.xlu0 %1799 }
0x23bc   :  { %v1802_v17 = vmul.f32 %v2508_v48, %v1800_v16 }
0x23be   :  { %1805 = vrot.lane.b32.xlu1 %v1802_v17, %s2526_s16 }
0x2430   :  { %v1806_v60 = vpop.permute.xlu1 %1805 }
0x2431   :  { %2409 = vmatmul.mubr.msk.f32.vlgmr.msra.gmra.mxu0 %vm42_vm1, %v1806_v60 }
0x24f1   :  { %v1875_v19 = vpop.f32.mrf.mxu0 }
0x24f2   :  { %v1879_v20 = vadd.f32 %v1875_v19, %v1180_v18 }
0x24f3   :  { %v2410_v21 = vpop.f32.mrf.mxu0 }
0x24f4   :  { %v2095_v22 = vmul.f32 -1.442695, %v1879_v20 }
0x24f6   :  { %2511 = vpow2.f32 %v2095_v22 }
0x2503   :  { %v2512_v23 = vpop.eup %2511 }
0x2504   :  { %v1883_v24 = vadd.f32 1.0, %v2512_v23 }
0x2506   :  { %2513 = vrcp.f32 %v1883_v24 }
0x2513   :  { %v2514_v25 = vpop.eup %2513 }
0x2514   :  { %v1886_v26 = vmul.f32 2.0, %v2514_v25  ;;  %v1888_v31 = vmul.f32 %v2514_v25, %v1796_v59 }
0x2516   :  { %v2096_v27 = vadd.f32 -1.0, %v1886_v26 }
0x2518   :  { %1890 = vrot.lane.b32.xlu0 %v2096_v27, %s2525_s15 }
0x258a   :  { %v1891_v28 = vpop.permute.xlu0 %1890 }
0x258b   :  { %v1893_v30 = vmul.f32 %v2514_v25, %v1891_v28 }
0x258d   :  { %1895 = vrot.lane.b32.xlu1 %v1893_v30, %s2526_s16 }
0x25ff   :  { %v1896_v32 = vpop.permute.xlu1 %1895 }
0x2600   :  { %v1898_v3 = vadd.f32 %v1896_v32, %v1888_v31 }
0x2602   :  { %2515 = vtanh.f32 %v1898_v3 }
0x260f   :  { %v2516_v33 = vpop.eup %2515 }
0x2610   :  { %1901 = vrot.lane.b32.xlu0 %v2516_v33, %s2525_s15 }
0x2682   :  { %v1902_v34 = vpop.permute.xlu0 %1901 }
0x2683   :  { %v1904_v35 = vmul.f32 %v2514_v25, %v1902_v34 }
0x2685   :  { %1907 = vrot.lane.b32.xlu1 %v1904_v35, %s2526_s16 }
0x26f7   :  { %v1908_v36 = vpop.permute.xlu1 %1907 }
0x26f8   :  { %2420 = vmatmul.mubr.msk.f32.vlgmr.msra.gmra.mxu1 %vm42_vm1, %v1908_v36 }
0x27b8   :  { %v1977_v38 = vpop.f32.mrf.mxu1 }
0x27b9   :  { %v1981_v39 = vadd.f32 %v1977_v38, %v1185_v37 }
0x27ba   :  { %v2421_v40 = vpop.f32.mrf.mxu1 }
0x27bb   :  { %v2098_v41 = vmul.f32 -1.442695, %v1981_v39 }
0x27bd   :  { %2517 = vpow2.f32 %v2098_v41 }
0x27ca   :  { %v2518_v42 = vpop.eup %2517 }
0x27cb   :  { %v1985_v43 = vadd.f32 1.0, %v2518_v42 }
0x27cd   :  { %2519 = vrcp.f32 %v1985_v43 }
0x27da   :  { %v2520_v44 = vpop.eup %2519 }
0x27db   :  { %v1988_v45 = vmul.f32 2.0, %v2520_v44  ;;  %v1990_v0 = vmul.f32 %v2520_v44, %v1898_v3 }
0x27dd   :  { %v2099_v63 = vadd.f32 -1.0, %v1988_v45 }
0x27df   :  { %1992 = vrot.lane.b32.xlu0 %v2099_v63, %s2525_s15 }
0x2851   :  { %v1993_v46 = vpop.permute.xlu0 %1992 }
0x2852   :  { %v1995_v51 = vmul.f32 %v2520_v44, %v1993_v46 }
0x2854   :  { %1997 = vrot.lane.b32.xlu1 %v1995_v51, %s2526_s16 }
0x2858   :  { %1029 = vrot.lane.b32.xlu1 %v2864_v29, %s2527_s22 }
0x28c6   :  { %v1998_v1 = vpop.permute.xlu1 %1997 }
0x28c7   :  { %v2000_v52 = vadd.f32 %v1998_v1, %v1990_v0 }
0x28c9   :  { %2521 = vtanh.f32 %v2000_v52  ;;  %2014 = vrot.lane.b32.xlu1 %v2000_v52, %s2527_s22 }
0x28ca   :  { %v1030_v53 = vpop.permute.xlu1 %1029 }
0x28cb   :  { %1032 = vst.msk [vmem:[%s2992_s5] sm:$0xff] %vm42_vm1, %v1030_v53 }
0x28d6   :  { %v2522_v54 = vpop.eup %2521 }
0x28d7   :  { %2003 = vrot.lane.b32.xlu0 %v2522_v54, %s2525_s15 }
0x293b   :  { %v2015_v55 = vpop.permute.xlu1 %2014 }
0x293c   :  { %2101 = vst.msk [vmem:[%s2992_s5 + $0x8] sm:$0xff] %vm42_vm1, %v2015_v55 }
0x2949   :  { %v2004_v29 = vpop.permute.xlu0 %2003 }
0x294a   :  { %v2006_v56 = vmul.f32 %v2520_v44, %v2004_v29 }
0x294c   :  { %2008 = vrot.lane.b32.xlu0 %v2006_v56, %s2526_s16 }
0x29be   :  { %v2009_v57 = vpop.permute.xlu0 %2008 }
0x29bf   :  { %2100 = vst.msk [vmem:[%s2991_s4 + $0x8] sm:$0xff] %vm42_vm1, %v2009_v57 }

</bundles_post_ra>
